<compile_context>
chip_gen: v7x
topology: tpu7x:2x2x1
jax: 0.10.0
libtpu: 0.0.40
codegen_flags: <defaults>
</compile_context>

<pallas_src>
import numpy as np
import jax
import jax.numpy as jnp
from jax import lax
from jax.experimental import pallas as pl
from jax.experimental.pallas import tpu as pltpu


def _round_up(x, m):
    return ((x + m - 1) // m) * m


# ------------------------- fused Pallas kernel -------------------------

def _make_fused_kernel(CP, C1, C2, Wp, Q1, QP, Q2, MARGIN, PMW):
    """conv1(3x3,pad1)+BN+ReLU -> maxpool2x2 -> conv2(3x3,pad1)+bias+ReLU, one image/step.

    Layout: channels on sublanes, flattened padded spatial (h*Wp + w) on lanes.
    """
    offs1 = [di * Wp + dj for di in range(3) for dj in range(3)]                    # conv1 taps
    offs2 = [(di - 1) * (2 * Wp) + (dj - 1) * 2 for di in range(3) for dj in range(3)]  # conv2 taps

    def kernel(x_ref, w1_ref, s1_ref, b1_ref, vm_ref, w2_ref, b2_ref,
               o_ref, y1_s, pm_s):
        # ---- conv1: 9 shifted matmuls on the MXU, accumulated in f32 ----
        acc1 = jnp.zeros((C1, Q1), jnp.float32)
        for t, o in enumerate(offs1):
            acc1 = acc1 + jnp.dot(w1_ref[:, t * CP:(t + 1) * CP],
                                  x_ref[:, o:o + Q1],
                                  preferred_element_type=jnp.float32)
        # fused BatchNorm(eval) affine + ReLU; y1 stays in VMEM scratch
        y1_s[...] = jnp.maximum(acc1 * s1_ref[...] + b1_ref[...], 0.0)

        # ---- 2x2 max-pool: window max over 4 shifted views of the resident y1 ----
        p = jnp.maximum(
            jnp.maximum(y1_s[:, pl.ds(0, QP)], y1_s[:, pl.ds(1, QP)]),
            jnp.maximum(y1_s[:, pl.ds(Wp, QP)], y1_s[:, pl.ds(Wp + 1, QP)]))
        # zero-filled margined scratch = conv2's zero padding ring; the static lane
        # mask removes garbage (non-pooled) lane positions of the strided pooled map.
        pm_s[...] = jnp.zeros((C1, PMW), jnp.float32)
        pm_s[:, pl.ds(MARGIN, QP)] = p * vm_ref[...]

        # ---- conv2: 9 shifted matmuls + bias + ReLU ----
        acc2 = jnp.zeros((C2, Q2), jnp.float32)
        for t, o in enumerate(offs2):
            acc2 = acc2 + jnp.dot(w2_ref[:, t * C1:(t + 1) * C1],
                                  pm_s[:, pl.ds(MARGIN + o, Q2)],
                                  preferred_element_type=jnp.float32)
        o_ref[...] = jnp.maximum(acc2 + b2_ref[...], 0.0)

    return kernel


# ------------------------- wrapper -------------------------

def feature_extractor_forward(x_nchw, p):
    eps = 1e-5
    N, Cin, H, W = x_nchw.shape
    assert H % 2 == 0 and W % 2 == 0
    C1 = p["w1"].shape[0]
    C2 = p["w2"].shape[0]
    Hp, Wp = H + 2, W + 2
    H2, W2 = H // 2, W // 2
    S = Hp * Wp                                   # flattened padded spatial per image

    # lane-length bookkeeping (all per-image, tiny)
    CP = _round_up(Cin, 8)                                       # pad Cin to a sublane tile
    QP = _round_up(2 * Wp * (H2 - 1) + 2 * (W2 - 1) + 1, 8)      # pooled (strided) extent
    Q1 = _round_up(QP + Wp + 1, 8)                               # conv1 output lanes
    L1 = _round_up(Q1 + 2 * Wp + 2, 128)                         # padded input lanes
    Q2 = S                                                       # conv2 output lanes
    MARGIN = _round_up(2 * Wp + 2, 8)                            # left zero margin for conv2
    PMW = _round_up(MARGIN + Q2 + 2 * Wp + 2, 128)               # pooled-scratch width

    # ---- input prep (tiny wrapper glue): zero-pad spatially & channel-pad, flatten ----
    xpad = jnp.pad(x_nchw, ((0, 0), (0, CP - Cin), (1, 1), (1, 1)))   # (N, CP, Hp, Wp)
    xflat = xpad.reshape(N, CP, S)
    xflat = jnp.pad(xflat, ((0, 0), (0, 0), (0, L1 - S)))             # (N, CP, L1)

    # ---- parameters: BN(eval) folded to per-channel scale/shift, taps laid out flat ----
    bn_scale = p["gamma"] / jnp.sqrt(p["var"] + eps)
    scale1 = bn_scale.reshape(C1, 1)
    shift1 = ((p["b1"] - p["mean"]) * bn_scale + p["beta"]).reshape(C1, 1)
    w1m = jnp.pad(p["w1"], ((0, 0), (0, CP - Cin), (0, 0), (0, 0)))
    w1m = jnp.transpose(w1m, (0, 2, 3, 1)).reshape(C1, 9 * CP)        # [co, (di,dj,ci)]
    w2m = jnp.transpose(p["w2"], (0, 2, 3, 1)).reshape(C2, 9 * C1)
    b2 = p["b2"].reshape(C2, 1)

    # ---- static validity mask for the strided pooled map (built once at trace time) ----
    k = np.arange(QP)
    half = k // 2
    vmask = (k % 2 == 0) & (half % Wp < W2) & (half // Wp < H2)
    vmask = jnp.asarray(vmask.astype(np.float32)[None, :])            # (1, QP)

    kernel = _make_fused_kernel(CP, C1, C2, Wp, Q1, QP, Q2, MARGIN, PMW)

    y2 = pl.pallas_call(
        kernel,
        out_shape=jax.ShapeDtypeStruct((N, C2, Q2), jnp.float32),
        grid=(N,),
        in_specs=[
            pl.BlockSpec((None, CP, L1), lambda n: (n, 0, 0)),
            pl.BlockSpec((C1, 9 * CP), lambda n: (0, 0)),
            pl.BlockSpec((C1, 1), lambda n: (0, 0)),
            pl.BlockSpec((C1, 1), lambda n: (0, 0)),
            pl.BlockSpec((1, QP), lambda n: (0, 0)),
            pl.BlockSpec((C2, 9 * C1), lambda n: (0, 0)),
            pl.BlockSpec((C2, 1), lambda n: (0, 0)),
        ],
        out_specs=pl.BlockSpec((None, C2, Q2), lambda n: (n, 0, 0)),
        scratch_shapes=[
            pltpu.VMEM((C1, Q1), jnp.float32),    # y1 (conv1+BN+ReLU), stays in VMEM
            pltpu.VMEM((C1, PMW), jnp.float32),   # zero-margined pooled map
        ],
        compiler_params=pltpu.CompilerParams(
            dimension_semantics=("parallel",)),
    )(xflat, w1m, scale1, shift1, vmask, w2m, b2)

    # ---- output glue: drop the strided/garbage lanes and flatten in NCHW order ----
    y2 = y2.reshape(N, C2, Hp // 2, Wp, 2)[:, :, :H2, :W2, 0]         # (N, C2, H2, W2)
    return y2.reshape(-1)


# ------------------------- pure-JAX reference -------------------------

def reference_forward(x_nchw, p):
    eps = 1e-5
    dn = ("NHWC", "HWIO", "NHWC")
    x = jnp.transpose(x_nchw, (0, 2, 3, 1))
    w1 = jnp.transpose(p["w1"], (2, 3, 1, 0))
    w2 = jnp.transpose(p["w2"], (2, 3, 1, 0))
    y = lax.conv_general_dilated(x, w1, (1, 1), "SAME", dimension_numbers=dn) + p["b1"]
    y = (y - p["mean"]) / jnp.sqrt(p["var"] + eps) * p["gamma"] + p["beta"]
    y = jnp.maximum(y, 0.0)
    y = lax.reduce_window(y, -jnp.inf, lax.max, (1, 2, 2, 1), (1, 2, 2, 1), "VALID")
    y = lax.conv_general_dilated(y, w2, (1, 1), "SAME", dimension_numbers=dn) + p["b2"]
    y = jnp.maximum(y, 0.0)
    return jnp.transpose(y, (0, 3, 1, 2)).reshape(-1)


# ------------------------- main -------------------------

if __name__ == "__main__":
    key = jax.random.PRNGKey(0)
    kx, k1, k2, k3, k4, k5, k6 = jax.random.split(key, 7)

    N, Cin, H, W = 2, 4, 16, 16
    C1, C2 = 8, 16

    x = jax.random.normal(kx, (N, Cin, H, W), jnp.float32)

    params = {
        "w1": 0.1 * jax.random.normal(k1, (C1, Cin, 3, 3), jnp.float32),
        "b1": 0.05 * jax.random.normal(k2, (C1,), jnp.float32),
        "gamma": 1.0 + 0.1 * jax.random.normal(k3, (C1,), jnp.float32),
        "beta": 0.1 * jax.random.normal(k4, (C1,), jnp.float32),
        "mean": 0.1 * jnp.arange(C1, dtype=jnp.float32),
        "var": 1.0 + 0.05 * jnp.arange(C1, dtype=jnp.float32),
        "w2": 0.1 * jax.random.normal(k5, (C2, C1, 3, 3), jnp.float32),
        "b2": 0.05 * jax.random.normal(k6, (C2,), jnp.float32),
    }

    out = jax.jit(feature_extractor_forward)(x, params)
    out = jax.block_until_ready(out)

    ref = reference_forward(x, params)
    assert out.shape == (N * C2 * (H // 2) * (W // 2),), out.shape
    assert jnp.allclose(out, ref, atol=1e-4, rtol=1e-4), float(jnp.max(jnp.abs(out - ref)))

    print("KERNEL_OK")
</pallas_src>

<mosaic_0001>
module attributes {stable_mosaic.version = 11 : i64} {
  func.func @kernel(%arg0: i32, %arg1: memref<1x8x384xf32, #tpu.memory_space<vmem>>, %arg2: memref<8x72xf32, #tpu.memory_space<vmem>>, %arg3: memref<8x1xf32, #tpu.memory_space<vmem>>, %arg4: memref<8x1xf32, #tpu.memory_space<vmem>>, %arg5: memref<1x272xf32, #tpu.memory_space<vmem>>, %arg6: memref<16x72xf32, #tpu.memory_space<vmem>>, %arg7: memref<16x1xf32, #tpu.memory_space<vmem>>, %arg8: memref<1x16x324xf32, #tpu.memory_space<vmem>>, %arg9: memref<8x296xf32, #tpu.memory_space<vmem>>, %arg10: memref<8x512xf32, #tpu.memory_space<vmem>>) attributes {dimension_semantics = [#tpu.dimension_semantics<parallel>], iteration_bounds = array<i64: 2>, scalar_prefetch = 0 : i64, scratch_operands = 2 : i64, tpu.core_type = #tpu.core_type<tc>, window_params = [{transform_indices = @transform_0, window_bounds = array<i64: 1, 8, 384>}, {pipeline_mode = #tpu.pipeline_mode<synchronous>, transform_indices = @transform_1, window_bounds = array<i64: 8, 72>}, {pipeline_mode = #tpu.pipeline_mode<synchronous>, transform_indices = @transform_2, window_bounds = array<i64: 8, 1>}, {pipeline_mode = #tpu.pipeline_mode<synchronous>, transform_indices = @transform_3, window_bounds = array<i64: 8, 1>}, {pipeline_mode = #tpu.pipeline_mode<synchronous>, transform_indices = @transform_4, window_bounds = array<i64: 1, 272>}, {pipeline_mode = #tpu.pipeline_mode<synchronous>, transform_indices = @transform_5, window_bounds = array<i64: 16, 72>}, {pipeline_mode = #tpu.pipeline_mode<synchronous>, transform_indices = @transform_6, window_bounds = array<i64: 16, 1>}, {transform_indices = @transform_7, window_bounds = array<i64: 1, 16, 324>}]} {
    %cst = arith.constant 0.000000e+00 : f32
    %0 = vector.broadcast %cst : f32 to vector<8x296xf32>
    %c0 = arith.constant 0 : index
    %c0_0 = arith.constant 0 : index
    %1 = vector.load %arg2[%c0, %c0_0] : memref<8x72xf32, #tpu.memory_space<vmem>>, vector<8x8xf32>
    %c0_1 = arith.constant 0 : index
    %c0_2 = arith.constant 0 : index
    %c0_3 = arith.constant 0 : index
    %2 = vector.load %arg1[%c0_1, %c0_2, %c0_3] : memref<1x8x384xf32, #tpu.memory_space<vmem>>, vector<1x8x296xf32>
    %3 = vector.shape_cast %2 : vector<1x8x296xf32> to vector<8x296xf32>
    %cst_4 = arith.constant dense<0.000000e+00> : vector<8x296xf32>
    %4 = tpu.matmul %1, %3, %cst_4 {dimension_numbers = #tpu.dot_dimension_numbers<[1], [0], [0], [1], [0, 0, 1, 1], [], []>} : vector<8x8xf32>, vector<8x296xf32>, vector<8x296xf32> -> vector<8x296xf32>
    %5 = arith.addf %0, %4 : vector<8x296xf32>
    %c0_5 = arith.constant 0 : index
    %c8 = arith.constant 8 : index
    %6 = vector.load %arg2[%c0_5, %c8] : memref<8x72xf32, #tpu.memory_space<vmem>>, vector<8x8xf32>
    %c0_6 = arith.constant 0 : index
    %c0_7 = arith.constant 0 : index
    %c1 = arith.constant 1 : index
    %7 = vector.load %arg1[%c0_6, %c0_7, %c1] : memref<1x8x384xf32, #tpu.memory_space<vmem>>, vector<1x8x296xf32>
    %8 = vector.shape_cast %7 : vector<1x8x296xf32> to vector<8x296xf32>
    %cst_8 = arith.constant dense<0.000000e+00> : vector<8x296xf32>
    %9 = tpu.matmul %6, %8, %cst_8 {dimension_numbers = #tpu.dot_dimension_numbers<[1], [0], [0], [1], [0, 0, 1, 1], [], []>} : vector<8x8xf32>, vector<8x296xf32>, vector<8x296xf32> -> vector<8x296xf32>
    %10 = arith.addf %5, %9 : vector<8x296xf32>
    %c0_9 = arith.constant 0 : index
    %c16 = arith.constant 16 : index
    %11 = vector.load %arg2[%c0_9, %c16] : memref<8x72xf32, #tpu.memory_space<vmem>>, vector<8x8xf32>
    %c0_10 = arith.constant 0 : index
    %c0_11 = arith.constant 0 : index
    %c2 = arith.constant 2 : index
    %12 = vector.load %arg1[%c0_10, %c0_11, %c2] : memref<1x8x384xf32, #tpu.memory_space<vmem>>, vector<1x8x296xf32>
    %13 = vector.shape_cast %12 : vector<1x8x296xf32> to vector<8x296xf32>
    %cst_12 = arith.constant dense<0.000000e+00> : vector<8x296xf32>
    %14 = tpu.matmul %11, %13, %cst_12 {dimension_numbers = #tpu.dot_dimension_numbers<[1], [0], [0], [1], [0, 0, 1, 1], [], []>} : vector<8x8xf32>, vector<8x296xf32>, vector<8x296xf32> -> vector<8x296xf32>
    %15 = arith.addf %10, %14 : vector<8x296xf32>
    %c0_13 = arith.constant 0 : index
    %c24 = arith.constant 24 : index
    %16 = vector.load %arg2[%c0_13, %c24] : memref<8x72xf32, #tpu.memory_space<vmem>>, vector<8x8xf32>
    %c0_14 = arith.constant 0 : index
    %c0_15 = arith.constant 0 : index
    %c18 = arith.constant 18 : index
    %17 = vector.load %arg1[%c0_14, %c0_15, %c18] : memref<1x8x384xf32, #tpu.memory_space<vmem>>, vector<1x8x296xf32>
    %18 = vector.shape_cast %17 : vector<1x8x296xf32> to vector<8x296xf32>
    %cst_16 = arith.constant dense<0.000000e+00> : vector<8x296xf32>
    %19 = tpu.matmul %16, %18, %cst_16 {dimension_numbers = #tpu.dot_dimension_numbers<[1], [0], [0], [1], [0, 0, 1, 1], [], []>} : vector<8x8xf32>, vector<8x296xf32>, vector<8x296xf32> -> vector<8x296xf32>
    %20 = arith.addf %15, %19 : vector<8x296xf32>
    %c0_17 = arith.constant 0 : index
    %c32 = arith.constant 32 : index
    %21 = vector.load %arg2[%c0_17, %c32] : memref<8x72xf32, #tpu.memory_space<vmem>>, vector<8x8xf32>
    %c0_18 = arith.constant 0 : index
    %c0_19 = arith.constant 0 : index
    %c19 = arith.constant 19 : index
    %22 = vector.load %arg1[%c0_18, %c0_19, %c19] : memref<1x8x384xf32, #tpu.memory_space<vmem>>, vector<1x8x296xf32>
    %23 = vector.shape_cast %22 : vector<1x8x296xf32> to vector<8x296xf32>
    %cst_20 = arith.constant dense<0.000000e+00> : vector<8x296xf32>
    %24 = tpu.matmul %21, %23, %cst_20 {dimension_numbers = #tpu.dot_dimension_numbers<[1], [0], [0], [1], [0, 0, 1, 1], [], []>} : vector<8x8xf32>, vector<8x296xf32>, vector<8x296xf32> -> vector<8x296xf32>
    %25 = arith.addf %20, %24 : vector<8x296xf32>
    %c0_21 = arith.constant 0 : index
    %c40 = arith.constant 40 : index
    %26 = vector.load %arg2[%c0_21, %c40] : memref<8x72xf32, #tpu.memory_space<vmem>>, vector<8x8xf32>
    %c0_22 = arith.constant 0 : index
    %c0_23 = arith.constant 0 : index
    %c20 = arith.constant 20 : index
    %27 = vector.load %arg1[%c0_22, %c0_23, %c20] : memref<1x8x384xf32, #tpu.memory_space<vmem>>, vector<1x8x296xf32>
    %28 = vector.shape_cast %27 : vector<1x8x296xf32> to vector<8x296xf32>
    %cst_24 = arith.constant dense<0.000000e+00> : vector<8x296xf32>
    %29 = tpu.matmul %26, %28, %cst_24 {dimension_numbers = #tpu.dot_dimension_numbers<[1], [0], [0], [1], [0, 0, 1, 1], [], []>} : vector<8x8xf32>, vector<8x296xf32>, vector<8x296xf32> -> vector<8x296xf32>
    %30 = arith.addf %25, %29 : vector<8x296xf32>
    %c0_25 = arith.constant 0 : index
    %c48 = arith.constant 48 : index
    %31 = vector.load %arg2[%c0_25, %c48] : memref<8x72xf32, #tpu.memory_space<vmem>>, vector<8x8xf32>
    %c0_26 = arith.constant 0 : index
    %c0_27 = arith.constant 0 : index
    %c36 = arith.constant 36 : index
    %32 = vector.load %arg1[%c0_26, %c0_27, %c36] : memref<1x8x384xf32, #tpu.memory_space<vmem>>, vector<1x8x296xf32>
    %33 = vector.shape_cast %32 : vector<1x8x296xf32> to vector<8x296xf32>
    %cst_28 = arith.constant dense<0.000000e+00> : vector<8x296xf32>
    %34 = tpu.matmul %31, %33, %cst_28 {dimension_numbers = #tpu.dot_dimension_numbers<[1], [0], [0], [1], [0, 0, 1, 1], [], []>} : vector<8x8xf32>, vector<8x296xf32>, vector<8x296xf32> -> vector<8x296xf32>
    %35 = arith.addf %30, %34 : vector<8x296xf32>
    %c0_29 = arith.constant 0 : index
    %c56 = arith.constant 56 : index
    %36 = vector.load %arg2[%c0_29, %c56] : memref<8x72xf32, #tpu.memory_space<vmem>>, vector<8x8xf32>
    %c0_30 = arith.constant 0 : index
    %c0_31 = arith.constant 0 : index
    %c37 = arith.constant 37 : index
    %37 = vector.load %arg1[%c0_30, %c0_31, %c37] : memref<1x8x384xf32, #tpu.memory_space<vmem>>, vector<1x8x296xf32>
    %38 = vector.shape_cast %37 : vector<1x8x296xf32> to vector<8x296xf32>
    %cst_32 = arith.constant dense<0.000000e+00> : vector<8x296xf32>
    %39 = tpu.matmul %36, %38, %cst_32 {dimension_numbers = #tpu.dot_dimension_numbers<[1], [0], [0], [1], [0, 0, 1, 1], [], []>} : vector<8x8xf32>, vector<8x296xf32>, vector<8x296xf32> -> vector<8x296xf32>
    %40 = arith.addf %35, %39 : vector<8x296xf32>
    %c0_33 = arith.constant 0 : index
    %c64 = arith.constant 64 : index
    %41 = vector.load %arg2[%c0_33, %c64] : memref<8x72xf32, #tpu.memory_space<vmem>>, vector<8x8xf32>
    %c0_34 = arith.constant 0 : index
    %c0_35 = arith.constant 0 : index
    %c38 = arith.constant 38 : index
    %42 = vector.load %arg1[%c0_34, %c0_35, %c38] : memref<1x8x384xf32, #tpu.memory_space<vmem>>, vector<1x8x296xf32>
    %43 = vector.shape_cast %42 : vector<1x8x296xf32> to vector<8x296xf32>
    %cst_36 = arith.constant dense<0.000000e+00> : vector<8x296xf32>
    %44 = tpu.matmul %41, %43, %cst_36 {dimension_numbers = #tpu.dot_dimension_numbers<[1], [0], [0], [1], [0, 0, 1, 1], [], []>} : vector<8x8xf32>, vector<8x296xf32>, vector<8x296xf32> -> vector<8x296xf32>
    %45 = arith.addf %40, %44 : vector<8x296xf32>
    %c0_37 = arith.constant 0 : index
    %c0_38 = arith.constant 0 : index
    %46 = vector.load %arg3[%c0_37, %c0_38] : memref<8x1xf32, #tpu.memory_space<vmem>>, vector<8x1xf32>
    %47 = vector.broadcast %46 : vector<8x1xf32> to vector<8x296xf32>
    %48 = arith.mulf %45, %47 : vector<8x296xf32>
    %c0_39 = arith.constant 0 : index
    %c0_40 = arith.constant 0 : index
    %49 = vector.load %arg4[%c0_39, %c0_40] : memref<8x1xf32, #tpu.memory_space<vmem>>, vector<8x1xf32>
    %50 = vector.broadcast %49 : vector<8x1xf32> to vector<8x296xf32>
    %51 = arith.addf %48, %50 : vector<8x296xf32>
    %cst_41 = arith.constant 0.000000e+00 : f32
    %52 = vector.broadcast %cst_41 : f32 to vector<8x296xf32>
    %53 = arith.maximumf %51, %52 : vector<8x296xf32>
    %c0_42 = arith.constant 0 : index
    %c0_43 = arith.constant 0 : index
    %54 = vector.load %arg9[%c0_42, %c0_43] : memref<8x296xf32, #tpu.memory_space<vmem>>, vector<8x296xf32>
    tpu.vector_store %arg9[%c0_42, %c0_43], %53 {strides = array<i32>} : memref<8x296xf32, #tpu.memory_space<vmem>>, vector<8x296xf32>,
    %c0_44 = arith.constant 0 : index
    %c0_45 = arith.constant 0 : index
    %55 = vector.load %arg9[%c0_44, %c0_45] : memref<8x296xf32, #tpu.memory_space<vmem>>, vector<8x272xf32>
    %c0_46 = arith.constant 0 : index
    %c1_47 = arith.constant 1 : index
    %56 = vector.load %arg9[%c0_46, %c1_47] : memref<8x296xf32, #tpu.memory_space<vmem>>, vector<8x272xf32>
    %57 = arith.maximumf %55, %56 : vector<8x272xf32>
    %c0_48 = arith.constant 0 : index
    %c18_49 = arith.constant 18 : index
    %58 = vector.load %arg9[%c0_48, %c18_49] : memref<8x296xf32, #tpu.memory_space<vmem>>, vector<8x272xf32>
    %c0_50 = arith.constant 0 : index
    %c19_51 = arith.constant 19 : index
    %59 = vector.load %arg9[%c0_50, %c19_51] : memref<8x296xf32, #tpu.memory_space<vmem>>, vector<8x272xf32>
    %60 = arith.maximumf %58, %59 : vector<8x272xf32>
    %61 = arith.maximumf %57, %60 : vector<8x272xf32>
    %cst_52 = arith.constant 0.000000e+00 : f32
    %62 = vector.broadcast %cst_52 : f32 to vector<8x512xf32>
    %c0_53 = arith.constant 0 : index
    %c0_54 = arith.constant 0 : index
    %63 = vector.load %arg10[%c0_53, %c0_54] : memref<8x512xf32, #tpu.memory_space<vmem>>, vector<8x512xf32>
    tpu.vector_store %arg10[%c0_53, %c0_54], %62 {strides = array<i32>} : memref<8x512xf32, #tpu.memory_space<vmem>>, vector<8x512xf32>,
    %c0_55 = arith.constant 0 : index
    %c0_56 = arith.constant 0 : index
    %64 = vector.load %arg5[%c0_55, %c0_56] : memref<1x272xf32, #tpu.memory_space<vmem>>, vector<1x272xf32>
    %65 = vector.broadcast %64 : vector<1x272xf32> to vector<8x272xf32>
    %66 = arith.mulf %61, %65 : vector<8x272xf32>
    %c0_57 = arith.constant 0 : index
    %c40_58 = arith.constant 40 : index
    %67 = vector.load %arg10[%c0_57, %c40_58] : memref<8x512xf32, #tpu.memory_space<vmem>>, vector<8x272xf32>
    tpu.vector_store %arg10[%c0_57, %c40_58], %66 {strides = array<i32>} : memref<8x512xf32, #tpu.memory_space<vmem>>, vector<8x272xf32>,
    %cst_59 = arith.constant 0.000000e+00 : f32
    %68 = vector.broadcast %cst_59 : f32 to vector<16x324xf32>
    %c0_60 = arith.constant 0 : index
    %c0_61 = arith.constant 0 : index
    %69 = vector.load %arg6[%c0_60, %c0_61] : memref<16x72xf32, #tpu.memory_space<vmem>>, vector<16x8xf32>
    %c0_62 = arith.constant 0 : index
    %c2_63 = arith.constant 2 : index
    %70 = vector.load %arg10[%c0_62, %c2_63] : memref<8x512xf32, #tpu.memory_space<vmem>>, vector<8x324xf32>
    %cst_64 = arith.constant dense<0.000000e+00> : vector<16x324xf32>
    %71 = tpu.matmul %69, %70, %cst_64 {dimension_numbers = #tpu.dot_dimension_numbers<[1], [0], [0], [1], [0, 0, 1, 1], [], []>} : vector<16x8xf32>, vector<8x324xf32>, vector<16x324xf32> -> vector<16x324xf32>
    %72 = arith.addf %68, %71 : vector<16x324xf32>
    %c0_65 = arith.constant 0 : index
    %c8_66 = arith.constant 8 : index
    %73 = vector.load %arg6[%c0_65, %c8_66] : memref<16x72xf32, #tpu.memory_space<vmem>>, vector<16x8xf32>
    %c0_67 = arith.constant 0 : index
    %c4 = arith.constant 4 : index
    %74 = vector.load %arg10[%c0_67, %c4] : memref<8x512xf32, #tpu.memory_space<vmem>>, vector<8x324xf32>
    %cst_68 = arith.constant dense<0.000000e+00> : vector<16x324xf32>
    %75 = tpu.matmul %73, %74, %cst_68 {dimension_numbers = #tpu.dot_dimension_numbers<[1], [0], [0], [1], [0, 0, 1, 1], [], []>} : vector<16x8xf32>, vector<8x324xf32>, vector<16x324xf32> -> vector<16x324xf32>
    %76 = arith.addf %72, %75 : vector<16x324xf32>
    %c0_69 = arith.constant 0 : index
    %c16_70 = arith.constant 16 : index
    %77 = vector.load %arg6[%c0_69, %c16_70] : memref<16x72xf32, #tpu.memory_space<vmem>>, vector<16x8xf32>
    %c0_71 = arith.constant 0 : index
    %c6 = arith.constant 6 : index
    %78 = vector.load %arg10[%c0_71, %c6] : memref<8x512xf32, #tpu.memory_space<vmem>>, vector<8x324xf32>
    %cst_72 = arith.constant dense<0.000000e+00> : vector<16x324xf32>
    %79 = tpu.matmul %77, %78, %cst_72 {dimension_numbers = #tpu.dot_dimension_numbers<[1], [0], [0], [1], [0, 0, 1, 1], [], []>} : vector<16x8xf32>, vector<8x324xf32>, vector<16x324xf32> -> vector<16x324xf32>
    %80 = arith.addf %76, %79 : vector<16x324xf32>
    %c0_73 = arith.constant 0 : index
    %c24_74 = arith.constant 24 : index
    %81 = vector.load %arg6[%c0_73, %c24_74] : memref<16x72xf32, #tpu.memory_space<vmem>>, vector<16x8xf32>
    %c0_75 = arith.constant 0 : index
    %c38_76 = arith.constant 38 : index
    %82 = vector.load %arg10[%c0_75, %c38_76] : memref<8x512xf32, #tpu.memory_space<vmem>>, vector<8x324xf32>
    %cst_77 = arith.constant dense<0.000000e+00> : vector<16x324xf32>
    %83 = tpu.matmul %81, %82, %cst_77 {dimension_numbers = #tpu.dot_dimension_numbers<[1], [0], [0], [1], [0, 0, 1, 1], [], []>} : vector<16x8xf32>, vector<8x324xf32>, vector<16x324xf32> -> vector<16x324xf32>
    %84 = arith.addf %80, %83 : vector<16x324xf32>
    %c0_78 = arith.constant 0 : index
    %c32_79 = arith.constant 32 : index
    %85 = vector.load %arg6[%c0_78, %c32_79] : memref<16x72xf32, #tpu.memory_space<vmem>>, vector<16x8xf32>
    %c0_80 = arith.constant 0 : index
    %c40_81 = arith.constant 40 : index
    %86 = vector.load %arg10[%c0_80, %c40_81] : memref<8x512xf32, #tpu.memory_space<vmem>>, vector<8x324xf32>
    %cst_82 = arith.constant dense<0.000000e+00> : vector<16x324xf32>
    %87 = tpu.matmul %85, %86, %cst_82 {dimension_numbers = #tpu.dot_dimension_numbers<[1], [0], [0], [1], [0, 0, 1, 1], [], []>} : vector<16x8xf32>, vector<8x324xf32>, vector<16x324xf32> -> vector<16x324xf32>
    %88 = arith.addf %84, %87 : vector<16x324xf32>
    %c0_83 = arith.constant 0 : index
    %c40_84 = arith.constant 40 : index
    %89 = vector.load %arg6[%c0_83, %c40_84] : memref<16x72xf32, #tpu.memory_space<vmem>>, vector<16x8xf32>
    %c0_85 = arith.constant 0 : index
    %c42 = arith.constant 42 : index
    %90 = vector.load %arg10[%c0_85, %c42] : memref<8x512xf32, #tpu.memory_space<vmem>>, vector<8x324xf32>
    %cst_86 = arith.constant dense<0.000000e+00> : vector<16x324xf32>
    %91 = tpu.matmul %89, %90, %cst_86 {dimension_numbers = #tpu.dot_dimension_numbers<[1], [0], [0], [1], [0, 0, 1, 1], [], []>} : vector<16x8xf32>, vector<8x324xf32>, vector<16x324xf32> -> vector<16x324xf32>
    %92 = arith.addf %88, %91 : vector<16x324xf32>
    %c0_87 = arith.constant 0 : index
    %c48_88 = arith.constant 48 : index
    %93 = vector.load %arg6[%c0_87, %c48_88] : memref<16x72xf32, #tpu.memory_space<vmem>>, vector<16x8xf32>
    %c0_89 = arith.constant 0 : index
    %c74 = arith.constant 74 : index
    %94 = vector.load %arg10[%c0_89, %c74] : memref<8x512xf32, #tpu.memory_space<vmem>>, vector<8x324xf32>
    %cst_90 = arith.constant dense<0.000000e+00> : vector<16x324xf32>
    %95 = tpu.matmul %93, %94, %cst_90 {dimension_numbers = #tpu.dot_dimension_numbers<[1], [0], [0], [1], [0, 0, 1, 1], [], []>} : vector<16x8xf32>, vector<8x324xf32>, vector<16x324xf32> -> vector<16x324xf32>
    %96 = arith.addf %92, %95 : vector<16x324xf32>
    %c0_91 = arith.constant 0 : index
    %c56_92 = arith.constant 56 : index
    %97 = vector.load %arg6[%c0_91, %c56_92] : memref<16x72xf32, #tpu.memory_space<vmem>>, vector<16x8xf32>
    %c0_93 = arith.constant 0 : index
    %c76 = arith.constant 76 : index
    %98 = vector.load %arg10[%c0_93, %c76] : memref<8x512xf32, #tpu.memory_space<vmem>>, vector<8x324xf32>
    %cst_94 = arith.constant dense<0.000000e+00> : vector<16x324xf32>
    %99 = tpu.matmul %97, %98, %cst_94 {dimension_numbers = #tpu.dot_dimension_numbers<[1], [0], [0], [1], [0, 0, 1, 1], [], []>} : vector<16x8xf32>, vector<8x324xf32>, vector<16x324xf32> -> vector<16x324xf32>
    %100 = arith.addf %96, %99 : vector<16x324xf32>
    %c0_95 = arith.constant 0 : index
    %c64_96 = arith.constant 64 : index
    %101 = vector.load %arg6[%c0_95, %c64_96] : memref<16x72xf32, #tpu.memory_space<vmem>>, vector<16x8xf32>
    %c0_97 = arith.constant 0 : index
    %c78 = arith.constant 78 : index
    %102 = vector.load %arg10[%c0_97, %c78] : memref<8x512xf32, #tpu.memory_space<vmem>>, vector<8x324xf32>
    %cst_98 = arith.constant dense<0.000000e+00> : vector<16x324xf32>
    %103 = tpu.matmul %101, %102, %cst_98 {dimension_numbers = #tpu.dot_dimension_numbers<[1], [0], [0], [1], [0, 0, 1, 1], [], []>} : vector<16x8xf32>, vector<8x324xf32>, vector<16x324xf32> -> vector<16x324xf32>
    %104 = arith.addf %100, %103 : vector<16x324xf32>
    %c0_99 = arith.constant 0 : index
    %c0_100 = arith.constant 0 : index
    %105 = vector.load %arg7[%c0_99, %c0_100] : memref<16x1xf32, #tpu.memory_space<vmem>>, vector<16x1xf32>
    %106 = vector.broadcast %105 : vector<16x1xf32> to vector<16x324xf32>
    %107 = arith.addf %104, %106 : vector<16x324xf32>
    %cst_101 = arith.constant 0.000000e+00 : f32
    %108 = vector.broadcast %cst_101 : f32 to vector<16x324xf32>
    %109 = arith.maximumf %107, %108 : vector<16x324xf32>
    %c0_102 = arith.constant 0 : index
    %c0_103 = arith.constant 0 : index
    %c0_104 = arith.constant 0 : index
    %110 = vector.load %arg8[%c0_102, %c0_103, %c0_104] : memref<1x16x324xf32, #tpu.memory_space<vmem>>, vector<1x16x324xf32>
    %111 = vector.shape_cast %110 : vector<1x16x324xf32> to vector<16x324xf32>
    %112 = vector.shape_cast %109 : vector<16x324xf32> to vector<1x16x324xf32>
    tpu.vector_store %arg8[%c0_102, %c0_103, %c0_104], %112 {strides = array<i32>} : memref<1x16x324xf32, #tpu.memory_space<vmem>>, vector<1x16x324xf32>,
    return
  }
  func.func @transform_0(%arg0: i32) -> (i32, i32, i32) {
    %c0_i32 = arith.constant 0 : i32
    %c0_i32_0 = arith.constant 0 : i32
    %c0_i32_1 = arith.constant 0 : i32
    return %arg0, %c0_i32, %c0_i32_0 : i32, i32, i32
  }
  func.func @transform_1(%arg0: i32) -> (i32, i32) {
    %c0_i32 = arith.constant 0 : i32
    %c0_i32_0 = arith.constant 0 : i32
    %c0_i32_1 = arith.constant 0 : i32
    return %c0_i32, %c0_i32_0 : i32, i32
  }
  func.func @transform_2(%arg0: i32) -> (i32, i32) {
    %c0_i32 = arith.constant 0 : i32
    %c0_i32_0 = arith.constant 0 : i32
    %c0_i32_1 = arith.constant 0 : i32
    return %c0_i32, %c0_i32_0 : i32, i32
  }
  func.func @transform_3(%arg0: i32) -> (i32, i32) {
    %c0_i32 = arith.constant 0 : i32
    %c0_i32_0 = arith.constant 0 : i32
    %c0_i32_1 = arith.constant 0 : i32
    return %c0_i32, %c0_i32_0 : i32, i32
  }
  func.func @transform_4(%arg0: i32) -> (i32, i32) {
    %c0_i32 = arith.constant 0 : i32
    %c0_i32_0 = arith.constant 0 : i32
    %c0_i32_1 = arith.constant 0 : i32
    return %c0_i32, %c0_i32_0 : i32, i32
  }
  func.func @transform_5(%arg0: i32) -> (i32, i32) {
    %c0_i32 = arith.constant 0 : i32
    %c0_i32_0 = arith.constant 0 : i32
    %c0_i32_1 = arith.constant 0 : i32
    return %c0_i32, %c0_i32_0 : i32, i32
  }
  func.func @transform_6(%arg0: i32) -> (i32, i32) {
    %c0_i32 = arith.constant 0 : i32
    %c0_i32_0 = arith.constant 0 : i32
    %c0_i32_1 = arith.constant 0 : i32
    return %c0_i32, %c0_i32_0 : i32, i32
  }
  func.func @transform_7(%arg0: i32) -> (i32, i32, i32) {
    %c0_i32 = arith.constant 0 : i32
    %c0_i32_0 = arith.constant 0 : i32
    %c0_i32_1 = arith.constant 0 : i32
    return %arg0, %c0_i32, %c0_i32_0 : i32, i32, i32
  }
}

</mosaic_0001>

<bundles_post_ra>
// kernel: squeeze.1
= control target key start
LH: loop header
LB: loop body
LE: loop exit
PB: predicated region body
PF: predicated region fallthrough
CT: control target
= control target key end

     0   :  { %vm7_vm0 = vcmask 1043458   ;;  %vm11_vm1 = vcmask 1045508   ;;  %vm15_vm2 = vcmask 1047558   ;;  %s86_s6 = smov 3  ;;  %s89_s7 = smov 12  ;;  %s1407_s0 = inlined_call_operand.vmem [shape: f32[2,16,8,8,1], index: 0, kind: input, shape index: {}]   ;;  %s1408_s1 = inlined_call_operand.hbm [shape: f32[2048], index: 1, kind: output, shape index: {}]  }
   0x1   :  { %v737_v0 = vld [vmem:[%s1407_s0 + $0xe] ss:$16 sm:%s86_s6]   ;;  %s94_s12 = smov 48  ;;  %s99_s13 = smov 192 }
   0x2   :  { %v738_v1 = vld [vmem:[%s1407_s0 + $0xe] ss:$16 sm:%s89_s7]   ;;  %s41_s18 = smov 3  ;;  %s44_s21 = smov 12 }
   0x3   :  { %v92_v2 = vsel %vm7_vm0, %v738_v1, %v737_v0  ;;  %v739_v3 = vld [vmem:[%s1407_s0 + $0xe] ss:$16 sm:%s94_s12]   ;;  %v729_v6 = vld [vmem:[%s1407_s0 + $0xf] ss:$16 sm:%s41_s18]   ;;  %s49_s22 = smov 48  ;;  %s54_s27 = smov 192 }
   0x4   :  { %v740_v4 = vld [vmem:[%s1407_s0 + $0xe] ss:$16 sm:%s99_s13]   ;;  %v97_v5 = vsel %vm11_vm1, %v739_v3, %v92_v2  ;;  %v730_v8 = vld [vmem:[%s1407_s0 + $0xf] ss:$16 sm:%s44_s21]   ;;  %s889_s28 = smov 112   ;;  %s108_s2 = smov 3 }
   0x5   :  { %v102_v7 = vsel %vm15_vm2, %v740_v4, %v97_v5  ;;  %v731_v9 = vld [vmem:[%s1407_s0 + $0xf] ss:$16 sm:%s49_s22]   ;;  %v47_v10 = vsel %vm7_vm0, %v730_v8, %v729_v6  ;;  %s111_s3 = smov 12  ;;  %v741_v13 = vld [vmem:[%s1407_s0 + $0x8e] ss:$16 sm:%s108_s2]   ;;  %s116_s8 = smov 48 }
   0x6   :  { %103 = vrot.lane.b32.xlu1 %v102_v7, %s889_s28  ;;  %v732_v11 = vld [vmem:[%s1407_s0 + $0xf] ss:$16 sm:%s54_s27]   ;;  %v52_v12 = vsel %vm11_vm1, %v731_v9, %v47_v10  ;;  %s121_s9 = smov 192  ;;  %s63_s14 = smov 3 }
   0x7   :  { %v742_v14 = vld [vmem:[%s1407_s0 + $0x8e] ss:$16 sm:%s111_s3]   ;;  %v57_v15 = vsel %vm15_vm2, %v732_v11, %v52_v12  ;;  %s66_s15 = smov 12  ;;  %s890_s16 = smov 120   ;;  %v733_v20 = vld [vmem:[%s1407_s0 + $0x8f] ss:$16 sm:%s63_s14]  }
   0x8   :  { %v114_v16 = vsel %vm7_vm0, %v742_v14, %v741_v13  ;;  %v743_v17 = vld [vmem:[%s1407_s0 + $0x8e] ss:$16 sm:%s116_s8]   ;;  %58 = vrot.lane.b32.xlu0 %v57_v15, %s890_s16  ;;  %s71_s19 = smov 48  ;;  %s76_s20 = smov 192 }
   0x9   :  { %v744_v18 = vld [vmem:[%s1407_s0 + $0x8e] ss:$16 sm:%s121_s9]   ;;  %v119_v19 = vsel %vm11_vm1, %v743_v17, %v114_v16 }
   0xa   :  { %2 = vsyncpa [#allocation1], 0  ;;  %v124_v21 = vsel %vm15_vm2, %v744_v18, %v119_v19  ;;  %v734_v22 = vld [vmem:[%s1407_s0 + $0x8f] ss:$16 sm:%s66_s15]   ;;  %s153_s25 = smov 3  ;;  %s161_s29 = smov 48 }
   0xb   :  { %v735_v23 = vld [vmem:[%s1407_s0 + $0x8f] ss:$16 sm:%s71_s19]   ;;  %125 = vrot.lane.b32.xlu1 %v124_v21, %s889_s28  ;;  %v69_v24 = vsel %vm7_vm0, %v734_v22, %v733_v20  ;;  %s156_s28 = smov 12  ;;  %s166_s5 = smov 192  ;;  %vm17_vm3 = vcmask 64512   ;;  %vm60_vm4 = vcmask 1048512  }
   0xc   :  { %v736_v25 = vld [vmem:[%s1407_s0 + $0x8f] ss:$16 sm:%s76_s20]   ;;  %v74_v26 = vsel %vm11_vm1, %v735_v23, %v69_v24  ;;  %v749_v27 = vld [vmem:[%s1407_s0 + $0x8d] ss:$16 sm:%s153_s25]   ;;  %s131_s6 = smov 3  ;;  %s134_s11 = smov 12 }
   0xd   :  { %v750_v28 = vld [vmem:[%s1407_s0 + $0x8d] ss:$16 sm:%s156_s28]   ;;  %v79_v29 = vsel %vm15_vm2, %v736_v25, %v74_v26  ;;  %s139_s12 = smov 48  ;;  %s144_s15 = smov 192  ;;  %vm105_vm5 = vcmask 982912   ;;  %vm150_vm6 = vcmask 917312  }
   0xe   :  { %v159_v30 = vsel %vm7_vm0, %v750_v28, %v749_v27  ;;  %v751_v31 = vld [vmem:[%s1407_s0 + $0x8d] ss:$16 sm:%s161_s29]   ;;  %80 = vrot.lane.b32.xlu0 %v79_v29, %s890_s16  ;;  %s198_s20 = smov 3  ;;  %s201_s21 = smov 12  ;;  %vm195_vm7 = vcmask 851712   ;;  %vm240_vm8 = vcmask 786112  }
   0xf   :  { %v752_v32 = vld [vmem:[%s1407_s0 + $0x8d] ss:$16 sm:%s166_s5]   ;;  %v164_v33 = vsel %vm11_vm1, %v751_v31, %v159_v30  ;;  %s891_s22 = smov 104   ;;  %s206_s25 = smov 48  ;;  %v757_v41 = vld [vmem:[%s1407_s0 + $0x8c] ss:$16 sm:%s198_s20]  }
  0x10   :  { %v745_v34 = vld [vmem:[%s1407_s0 + $0xd] ss:$16 sm:%s131_s6]   ;;  %v169_v35 = vsel %vm15_vm2, %v752_v32, %v164_v33  ;;  %s211_s26 = smov 192  ;;  %v758_v42 = vld [vmem:[%s1407_s0 + $0x8c] ss:$16 sm:%s201_s21]   ;;  %s176_s2 = smov 3 }
  0x11   :  { %v746_v36 = vld [vmem:[%s1407_s0 + $0xd] ss:$16 sm:%s134_s11]   ;;  %170 = vrot.lane.b32.xlu1 %v169_v35, %s891_s22  ;;  %s179_s3 = smov 12  ;;  %v204_v44 = vsel %vm7_vm0, %v758_v42, %v757_v41  ;;  %s184_s8 = smov 48  ;;  %vm285_vm9 = vcmask 720512   ;;  %vm330_vm10 = vcmask 654912  }
  0x12   :  { %v747_v37 = vld [vmem:[%s1407_s0 + $0xd] ss:$16 sm:%s139_s12]   ;;  %v137_v38 = vsel %vm7_vm0, %v746_v36, %v745_v34  ;;  %v759_v45 = vld [vmem:[%s1407_s0 + $0x8c] ss:$16 sm:%s206_s25]   ;;  %s189_s9 = smov 192  ;;  %s243_s12 = smov 3 }
  0x13   :  { %v748_v39 = vld [vmem:[%s1407_s0 + $0xd] ss:$16 sm:%s144_s15]   ;;  %v142_v40 = vsel %vm11_vm1, %v747_v37, %v137_v38  ;;  %v760_v46 = vld [vmem:[%s1407_s0 + $0x8c] ss:$16 sm:%s211_s26]   ;;  %v209_v47 = vsel %vm11_vm1, %v759_v45, %v204_v44  ;;  %s246_s17 = smov 12  ;;  %s251_s18 = smov 48 }
  0x14   :  { %v147_v43 = vsel %vm15_vm2, %v748_v39, %v142_v40  ;;  %v753_v48 = vld [vmem:[%s1407_s0 + $0xc] ss:$16 sm:%s176_s2]   ;;  %v214_v49 = vsel %vm15_vm2, %v760_v46, %v209_v47  ;;  %s892_s19 = smov 96   ;;  %s221_s23 = smov 3  ;;  %v765_v55 = vld [vmem:[%s1407_s0 + $0x8b] ss:$16 sm:%s243_s12]  }
  0x15   :  { %148 = vrot.lane.b32.xlu0 %v147_v43, %s891_s22  ;;  %v754_v50 = vld [vmem:[%s1407_s0 + $0xc] ss:$16 sm:%s179_s3]   ;;  %215 = vrot.lane.b32.xlu1 %v214_v49, %s892_s19  ;;  %s256_s22 = smov 192  ;;  %s224_s28 = smov 12  ;;  %vm375_vm11 = vcmask 589312   ;;  %vm420_vm12 = vcmask 523712  }
  0x16   :  { %v755_v51 = vld [vmem:[%s1407_s0 + $0xc] ss:$16 sm:%s184_s8]   ;;  %v182_v52 = vsel %vm7_vm0, %v754_v50, %v753_v48  ;;  %v766_v56 = vld [vmem:[%s1407_s0 + $0x8b] ss:$16 sm:%s246_s17]   ;;  %s229_s29 = smov 48  ;;  %s234_s5 = smov 192 }
  0x17   :  { %v756_v53 = vld [vmem:[%s1407_s0 + $0xc] ss:$16 sm:%s189_s9]   ;;  %v187_v54 = vsel %vm11_vm1, %v755_v51, %v182_v52  ;;  %v249_v58 = vsel %vm7_vm0, %v766_v56, %v765_v55  ;;  %v767_v59 = vld [vmem:[%s1407_s0 + $0x8b] ss:$16 sm:%s251_s18]   ;;  %s288_s8 = smov 3  ;;  %s291_s9 = smov 12 }
  0x18   :  { %v192_v57 = vsel %vm15_vm2, %v756_v53, %v187_v54  ;;  %v768_v60 = vld [vmem:[%s1407_s0 + $0x8b] ss:$16 sm:%s256_s22]   ;;  %v254_v61 = vsel %vm11_vm1, %v767_v59, %v249_v58  ;;  %s296_s14 = smov 48  ;;  %s301_s15 = smov 192  ;;  %v773_v5 = vld [vmem:[%s1407_s0 + $0x8a] ss:$16 sm:%s288_s8]  }
  0x19   :  { %193 = vrot.lane.b32.xlu0 %v192_v57, %s892_s19  ;;  %v761_v62 = vld [vmem:[%s1407_s0 + $0xb] ss:$16 sm:%s221_s23]   ;;  %v259_v63 = vsel %vm15_vm2, %v768_v60, %v254_v61  ;;  %s893_s16 = smov 88   ;;  %s266_s19 = smov 3  ;;  %vm465_vm13 = vcmask 458112   ;;  %vm510_vm14 = vcmask 392512  }
  0x1a   :  { %v762_v0 = vld [vmem:[%s1407_s0 + $0xb] ss:$16 sm:%s224_s28]   ;;  %260 = vrot.lane.b32.xlu1 %v259_v63, %s893_s16  ;;  %s269_s24 = smov 12  ;;  %s274_s25 = smov 48  ;;  %vm555_vm15 = vcmask 326912  }
  0x1b   :  { %v763_v1 = vld [vmem:[%s1407_s0 + $0xb] ss:$16 sm:%s229_s29]   ;;  %v227_v2 = vsel %vm7_vm0, %v762_v0, %v761_v62  ;;  %v774_v6 = vld [vmem:[%s1407_s0 + $0x8a] ss:$16 sm:%s291_s9]   ;;  %s279_s30 = smov 192  ;;  %s333_s4 = smov 3 }
  0x1c   :  { %v764_v3 = vld [vmem:[%s1407_s0 + $0xb] ss:$16 sm:%s234_s5]   ;;  %v232_v4 = vsel %vm11_vm1, %v763_v1, %v227_v2  ;;  %v294_v8 = vsel %vm7_vm0, %v774_v6, %v773_v5  ;;  %v775_v9 = vld [vmem:[%s1407_s0 + $0x8a] ss:$16 sm:%s296_s14]   ;;  %s336_s5 = smov 12  ;;  %s341_s10 = smov 48 }
  0x1d   :  { %v237_v7 = vsel %vm15_vm2, %v764_v3, %v232_v4  ;;  %v776_v10 = vld [vmem:[%s1407_s0 + $0x8a] ss:$16 sm:%s301_s15]   ;;  %v299_v11 = vsel %vm11_vm1, %v775_v9, %v294_v8  ;;  %s346_s11 = smov 192  ;;  %s894_s12 = smov 80   ;;  %v781_v19 = vld [vmem:[%s1407_s0 + $0x89] ss:$16 sm:%s333_s4]  }
  0x1e   :  { %238 = vrot.lane.b32.xlu0 %v237_v7, %s893_s16  ;;  %v769_v12 = vld [vmem:[%s1407_s0 + $0xa] ss:$16 sm:%s266_s19]   ;;  %v304_v13 = vsel %vm15_vm2, %v776_v10, %v299_v11  ;;  %s311_s15 = smov 3  ;;  %s314_s20 = smov 12 }
  0x1f   :  { %v770_v14 = vld [vmem:[%s1407_s0 + $0xa] ss:$16 sm:%s269_s24]   ;;  %305 = vrot.lane.b32.xlu1 %v304_v13, %s894_s12  ;;  %s319_s21 = smov 48  ;;  %s324_s26 = smov 192 }
  0x20   :  { %v771_v15 = vld [vmem:[%s1407_s0 + $0xa] ss:$16 sm:%s274_s25]   ;;  %v272_v16 = vsel %vm7_vm0, %v770_v14, %v769_v12  ;;  %v782_v20 = vld [vmem:[%s1407_s0 + $0x89] ss:$16 sm:%s336_s5]   ;;  %s378_s29 = smov 3  ;;  %s386_s6 = smov 48 }
  0x21   :  { %v772_v17 = vld [vmem:[%s1407_s0 + $0xa] ss:$16 sm:%s279_s30]   ;;  %v277_v18 = vsel %vm11_vm1, %v771_v15, %v272_v16  ;;  %v339_v22 = vsel %vm7_vm0, %v782_v20, %v781_v19  ;;  %v783_v23 = vld [vmem:[%s1407_s0 + $0x89] ss:$16 sm:%s341_s10]   ;;  %s381_s30 = smov 12  ;;  %s391_s7 = smov 192 }
  0x22   :  { %v282_v21 = vsel %vm15_vm2, %v772_v17, %v277_v18  ;;  %v784_v24 = vld [vmem:[%s1407_s0 + $0x89] ss:$16 sm:%s346_s11]   ;;  %v344_v25 = vsel %vm11_vm1, %v783_v23, %v339_v22  ;;  %s895_s8 = smov 72   ;;  %s356_s11 = smov 3  ;;  %v789_v33 = vld [vmem:[%s1407_s0 + $0x88] ss:$16 sm:%s378_s29]  }
  0x23   :  { %283 = vrot.lane.b32.xlu0 %v282_v21, %s894_s12  ;;  %v777_v26 = vld [vmem:[%s1407_s0 + $0x9] ss:$16 sm:%s311_s15]   ;;  %v349_v27 = vsel %vm15_vm2, %v784_v24, %v344_v25  ;;  %s359_s16 = smov 12  ;;  %s364_s17 = smov 48 }
  0x24   :  { %v778_v28 = vld [vmem:[%s1407_s0 + $0x9] ss:$16 sm:%s314_s20]   ;;  %350 = vrot.lane.b32.xlu1 %v349_v27, %s895_s8  ;;  %s369_s22 = smov 192  ;;  %s423_s25 = smov 3 }
  0x25   :  { %v779_v29 = vld [vmem:[%s1407_s0 + $0x9] ss:$16 sm:%s319_s21]   ;;  %v317_v30 = vsel %vm7_vm0, %v778_v28, %v777_v26  ;;  %v790_v34 = vld [vmem:[%s1407_s0 + $0x88] ss:$16 sm:%s381_s30]   ;;  %s431_s2 = smov 48  ;;  %s436_s3 = smov 192 }
  0x26   :  { %v780_v31 = vld [vmem:[%s1407_s0 + $0x9] ss:$16 sm:%s324_s26]   ;;  %v322_v32 = vsel %vm11_vm1, %v779_v29, %v317_v30  ;;  %v384_v36 = vsel %vm7_vm0, %v790_v34, %v789_v33  ;;  %v791_v37 = vld [vmem:[%s1407_s0 + $0x88] ss:$16 sm:%s386_s6]   ;;  %s426_s26 = smov 12  ;;  %s896_s4 = smov 64  }
  0x27   :  { %v327_v35 = vsel %vm15_vm2, %v780_v31, %v322_v32  ;;  %v792_v38 = vld [vmem:[%s1407_s0 + $0x88] ss:$16 sm:%s391_s7]   ;;  %v389_v39 = vsel %vm11_vm1, %v791_v37, %v384_v36  ;;  %s401_s7 = smov 3  ;;  %v797_v47 = vld [vmem:[%s1407_s0 + $0x87] ss:$16 sm:%s423_s25]   ;;  %s404_s12 = smov 12 }
  0x28   :  { %328 = vrot.lane.b32.xlu0 %v327_v35, %s895_s8  ;;  %v785_v40 = vld [vmem:[%s1407_s0 + $0x8] ss:$16 sm:%s356_s11]   ;;  %v394_v41 = vsel %vm15_vm2, %v792_v38, %v389_v39  ;;  %s409_s13 = smov 48  ;;  %s414_s18 = smov 192 }
  0x29   :  { %v786_v42 = vld [vmem:[%s1407_s0 + $0x8] ss:$16 sm:%s359_s16]   ;;  %395 = vrot.lane.b32.xlu1 %v394_v41, %s896_s4  ;;  %s468_s21 = smov 3  ;;  %s476_s27 = smov 48 }
  0x2a   :  { %v787_v43 = vld [vmem:[%s1407_s0 + $0x8] ss:$16 sm:%s364_s17]   ;;  %v362_v44 = vsel %vm7_vm0, %v786_v42, %v785_v40  ;;  %v798_v48 = vld [vmem:[%s1407_s0 + $0x87] ss:$16 sm:%s426_s26]   ;;  %s481_s28 = smov 192  ;;  %s897_s29 = smov 56  }
  0x2b   :  { %v788_v45 = vld [vmem:[%s1407_s0 + $0x8] ss:$16 sm:%s369_s22]   ;;  %v367_v46 = vsel %vm11_vm1, %v787_v43, %v362_v44  ;;  %v429_v50 = vsel %vm7_vm0, %v798_v48, %v797_v47  ;;  %v799_v51 = vld [vmem:[%s1407_s0 + $0x87] ss:$16 sm:%s431_s2]   ;;  %s471_s22 = smov 12  ;;  %s449_s8 = smov 12 }
  0x2c   :  { %v372_v49 = vsel %vm15_vm2, %v788_v45, %v367_v46  ;;  %v800_v52 = vld [vmem:[%s1407_s0 + $0x87] ss:$16 sm:%s436_s3]   ;;  %v434_v53 = vsel %vm11_vm1, %v799_v51, %v429_v50  ;;  %s446_s3 = smov 3  ;;  %v805_v61 = vld [vmem:[%s1407_s0 + $0x86] ss:$16 sm:%s468_s21]   ;;  %s454_s9 = smov 48 }
  0x2d   :  { %373 = vrot.lane.b32.xlu0 %v372_v49, %s896_s4  ;;  %v793_v54 = vld [vmem:[%s1407_s0 + $0x7] ss:$16 sm:%s401_s7]   ;;  %v439_v55 = vsel %vm15_vm2, %v800_v52, %v434_v53  ;;  %s459_s14 = smov 192  ;;  %s513_s17 = smov 3 }
  0x2e   :  { %v794_v56 = vld [vmem:[%s1407_s0 + $0x7] ss:$16 sm:%s404_s12]   ;;  %440 = vrot.lane.b32.xlu1 %v439_v55, %s897_s29  ;;  %s521_s23 = smov 48  ;;  %s526_s24 = smov 192 }
  0x2f   :  { %v795_v57 = vld [vmem:[%s1407_s0 + $0x7] ss:$16 sm:%s409_s13]   ;;  %v407_v58 = vsel %vm7_vm0, %v794_v56, %v793_v54  ;;  %v806_v62 = vld [vmem:[%s1407_s0 + $0x86] ss:$16 sm:%s471_s22]   ;;  %s898_s25 = smov 48   ;;  %s494_s4 = smov 12 }
  0x30   :  { %v796_v59 = vld [vmem:[%s1407_s0 + $0x7] ss:$16 sm:%s414_s18]   ;;  %v412_v60 = vsel %vm11_vm1, %v795_v57, %v407_v58  ;;  %v474_v0 = vsel %vm7_vm0, %v806_v62, %v805_v61  ;;  %v807_v1 = vld [vmem:[%s1407_s0 + $0x86] ss:$16 sm:%s476_s27]   ;;  %s516_s18 = smov 12  ;;  %s499_s5 = smov 48 }
  0x31   :  { %v417_v63 = vsel %vm15_vm2, %v796_v59, %v412_v60  ;;  %v808_v2 = vld [vmem:[%s1407_s0 + $0x86] ss:$16 sm:%s481_s28]   ;;  %v479_v3 = vsel %vm11_vm1, %v807_v1, %v474_v0  ;;  %s491_s28 = smov 3  ;;  %v813_v11 = vld [vmem:[%s1407_s0 + $0x85] ss:$16 sm:%s513_s17]   ;;  %s504_s10 = smov 192 }
  0x32   :  { %418 = vrot.lane.b32.xlu0 %v417_v63, %s897_s29  ;;  %v801_v4 = vld [vmem:[%s1407_s0 + $0x6] ss:$16 sm:%s446_s3]   ;;  %v484_v5 = vsel %vm15_vm2, %v808_v2, %v479_v3  ;;  %s558_s13 = smov 3  ;;  %s566_s19 = smov 48 }
  0x33   :  { %v802_v6 = vld [vmem:[%s1407_s0 + $0x6] ss:$16 sm:%s449_s8]   ;;  %485 = vrot.lane.b32.xlu1 %v484_v5, %s898_s25  ;;  %s571_s20 = smov 192  ;;  %s899_s21 = smov 40  }
  0x34   :  { %v803_v7 = vld [vmem:[%s1407_s0 + $0x6] ss:$16 sm:%s454_s9]   ;;  %v452_v8 = vsel %vm7_vm0, %v802_v6, %v801_v4  ;;  %v814_v12 = vld [vmem:[%s1407_s0 + $0x85] ss:$16 sm:%s516_s18]   ;;  %s539_s29 = smov 12  ;;  %s544_s30 = smov 48 }
  0x35   :  { %v804_v9 = vld [vmem:[%s1407_s0 + $0x6] ss:$16 sm:%s459_s14]   ;;  %v457_v10 = vsel %vm11_vm1, %v803_v7, %v452_v8  ;;  %v519_v14 = vsel %vm7_vm0, %v814_v12, %v813_v11  ;;  %v815_v15 = vld [vmem:[%s1407_s0 + $0x85] ss:$16 sm:%s521_s23]   ;;  %s561_s14 = smov 12  ;;  %s549_s6 = smov 192 }
  0x36   :  { %v462_v13 = vsel %vm15_vm2, %v804_v9, %v457_v10  ;;  %v816_v16 = vld [vmem:[%s1407_s0 + $0x85] ss:$16 sm:%s526_s24]   ;;  %v524_v17 = vsel %vm11_vm1, %v815_v15, %v519_v14  ;;  %s536_s24 = smov 3  ;;  %v821_v25 = vld [vmem:[%s1407_s0 + $0x84] ss:$16 sm:%s558_s13]   ;;  %s603_s9 = smov 3 }
  0x37   :  { %463 = vrot.lane.b32.xlu0 %v462_v13, %s898_s25  ;;  %v809_v18 = vld [vmem:[%s1407_s0 + $0x5] ss:$16 sm:%s491_s28]   ;;  %v529_v19 = vsel %vm15_vm2, %v816_v16, %v524_v17  ;;  %s611_s15 = smov 48  ;;  %s616_s16 = smov 192 }
  0x38   :  { %v810_v20 = vld [vmem:[%s1407_s0 + $0x5] ss:$16 sm:%s494_s4]   ;;  %530 = vrot.lane.b32.xlu1 %v529_v19, %s899_s21  ;;  %s900_s17 = smov 32   ;;  %s584_s25 = smov 12 }
  0x39   :  { %v811_v21 = vld [vmem:[%s1407_s0 + $0x5] ss:$16 sm:%s499_s5]   ;;  %v497_v22 = vsel %vm7_vm0, %v810_v20, %v809_v18  ;;  %v822_v26 = vld [vmem:[%s1407_s0 + $0x84] ss:$16 sm:%s561_s14]   ;;  %s589_s26 = smov 48  ;;  %s594_s2 = smov 192 }
  0x3a   :  { %v812_v23 = vld [vmem:[%s1407_s0 + $0x5] ss:$16 sm:%s504_s10]   ;;  %v502_v24 = vsel %vm11_vm1, %v811_v21, %v497_v22  ;;  %v564_v28 = vsel %vm7_vm0, %v822_v26, %v821_v25  ;;  %v823_v29 = vld [vmem:[%s1407_s0 + $0x84] ss:$16 sm:%s566_s19]   ;;  %s606_s10 = smov 12  ;;  %s648_s5 = smov 3 }
  0x3b   :  { %v507_v27 = vsel %vm15_vm2, %v812_v23, %v502_v24  ;;  %v824_v30 = vld [vmem:[%s1407_s0 + $0x84] ss:$16 sm:%s571_s20]   ;;  %v569_v31 = vsel %vm11_vm1, %v823_v29, %v564_v28  ;;  %s581_s20 = smov 3  ;;  %v829_v39 = vld [vmem:[%s1407_s0 + $0x83] ss:$16 sm:%s603_s9]   ;;  %s656_s11 = smov 48 }
  0x3c   :  { %508 = vrot.lane.b32.xlu0 %v507_v27, %s899_s21  ;;  %v817_v32 = vld [vmem:[%s1407_s0 + $0x4] ss:$16 sm:%s536_s24]   ;;  %v574_v33 = vsel %vm15_vm2, %v824_v30, %v569_v31  ;;  %s661_s12 = smov 192  ;;  %s901_s13 = smov 24  }
  0x3d   :  { %v818_v34 = vld [vmem:[%s1407_s0 + $0x4] ss:$16 sm:%s539_s29]   ;;  %575 = vrot.lane.b32.xlu1 %v574_v33, %s900_s17  ;;  %s629_s21 = smov 12  ;;  %s634_s22 = smov 48 }
  0x3e   :  { %v819_v35 = vld [vmem:[%s1407_s0 + $0x4] ss:$16 sm:%s544_s30]   ;;  %v542_v36 = vsel %vm7_vm0, %v818_v34, %v817_v32  ;;  %v830_v40 = vld [vmem:[%s1407_s0 + $0x83] ss:$16 sm:%s606_s10]   ;;  %s639_s27 = smov 192  ;;  %s693_s30 = smov 3 }
  0x3f   :  { %v820_v37 = vld [vmem:[%s1407_s0 + $0x4] ss:$16 sm:%s549_s6]   ;;  %v547_v38 = vsel %vm11_vm1, %v819_v35, %v542_v36  ;;  %v609_v42 = vsel %vm7_vm0, %v830_v40, %v829_v39  ;;  %v831_v43 = vld [vmem:[%s1407_s0 + $0x83] ss:$16 sm:%s611_s15]   ;;  %s651_s6 = smov 12  ;;  %s701_s7 = smov 48 }
  0x40   :  { %v552_v41 = vsel %vm15_vm2, %v820_v37, %v547_v38  ;;  %v832_v44 = vld [vmem:[%s1407_s0 + $0x83] ss:$16 sm:%s616_s16]   ;;  %v614_v45 = vsel %vm11_vm1, %v831_v43, %v609_v42  ;;  %s626_s16 = smov 3  ;;  %v837_v53 = vld [vmem:[%s1407_s0 + $0x82] ss:$16 sm:%s648_s5]   ;;  %s706_s8 = smov 192 }
  0x41   :  { %553 = vrot.lane.b32.xlu0 %v552_v41, %s900_s17  ;;  %v825_v46 = vld [vmem:[%s1407_s0 + $0x3] ss:$16 sm:%s581_s20]   ;;  %v619_v47 = vsel %vm15_vm2, %v832_v44, %v614_v45  ;;  %s902_s9 = smov 16   ;;  %s674_s17 = smov 12 }
  0x42   :  { %v826_v48 = vld [vmem:[%s1407_s0 + $0x3] ss:$16 sm:%s584_s25]   ;;  %620 = vrot.lane.b32.xlu1 %v619_v47, %s901_s13  ;;  %s679_s18 = smov 48  ;;  %s684_s23 = smov 192 }
  0x43   :  { %v827_v49 = vld [vmem:[%s1407_s0 + $0x3] ss:$16 sm:%s589_s26]   ;;  %v587_v50 = vsel %vm7_vm0, %v826_v48, %v825_v46  ;;  %v838_v54 = vld [vmem:[%s1407_s0 + $0x82] ss:$16 sm:%s651_s6]   ;;  %s9_s26 = smov 48  ;;  %s3_s3 = smov 3 }
  0x44   :  { %v828_v51 = vld [vmem:[%s1407_s0 + $0x3] ss:$16 sm:%s594_s2]   ;;  %v592_v52 = vsel %vm11_vm1, %v827_v49, %v587_v50  ;;  %v654_v56 = vsel %vm7_vm0, %v838_v54, %v837_v53  ;;  %v839_v57 = vld [vmem:[%s1407_s0 + $0x82] ss:$16 sm:%s656_s11]   ;;  %s696_s2 = smov 12  ;;  %s5_s4 = smov 12 }
  0x45   :  { %v597_v55 = vsel %vm15_vm2, %v828_v51, %v592_v52  ;;  %v840_v58 = vld [vmem:[%s1407_s0 + $0x82] ss:$16 sm:%s661_s12]   ;;  %v659_v59 = vsel %vm11_vm1, %v839_v57, %v654_v56  ;;  %s671_s12 = smov 3  ;;  %v845_v3 = vld [vmem:[%s1407_s0 + $0x81] ss:$16 sm:%s693_s30]   ;;  %s903_s5 = smov 8  }
  0x46   :  { %598 = vrot.lane.b32.xlu0 %v597_v55, %s901_s13  ;;  %v833_v60 = vld [vmem:[%s1407_s0 + $0x2] ss:$16 sm:%s626_s16]   ;;  %v664_v61 = vsel %vm15_vm2, %v840_v58, %v659_v59  ;;  %s23_s13 = smov 12  ;;  %s28_s14 = smov 48 }
  0x47   :  { %v834_v62 = vld [vmem:[%s1407_s0 + $0x2] ss:$16 sm:%s629_s21]   ;;  %665 = vrot.lane.b32.xlu1 %v664_v61, %s902_s9  ;;  %s33_s19 = smov 192 }
  0x48   :  { %v835_v63 = vld [vmem:[%s1407_s0 + $0x2] ss:$16 sm:%s634_s22]   ;;  %v632_v0 = vsel %vm7_vm0, %v834_v62, %v833_v60  ;;  %v846_v4 = vld [vmem:[%s1407_s0 + $0x81] ss:$16 sm:%s696_s2]  }
  0x49   :  { %v836_v1 = vld [vmem:[%s1407_s0 + $0x2] ss:$16 sm:%s639_s27]   ;;  %v637_v2 = vsel %vm11_vm1, %v835_v63, %v632_v0  ;;  %v699_v6 = vsel %vm7_vm0, %v846_v4, %v845_v3  ;;  %v847_v7 = vld [vmem:[%s1407_s0 + $0x81] ss:$16 sm:%s701_s7]   ;;  %s13_s27 = smov 192 }
  0x4a   :  { %v642_v5 = vsel %vm15_vm2, %v836_v1, %v637_v2  ;;  %v848_v8 = vld [vmem:[%s1407_s0 + $0x81] ss:$16 sm:%s706_s8]   ;;  %v704_v9 = vsel %vm11_vm1, %v847_v7, %v699_v6  ;;  %s20_s8 = smov 3  ;;  %v10_v17 = vld [vmem:[%s1407_s0] ss:$16 sm:%s9_s26]  }
  0x4b   :  { %643 = vrot.lane.b32.xlu0 %v642_v5, %s902_s9  ;;  %v841_v10 = vld [vmem:[%s1407_s0 + $0x1] ss:$16 sm:%s671_s12]   ;;  %v709_v11 = vsel %vm15_vm2, %v848_v8, %v704_v9 }
  0x4c   :  { %v842_v12 = vld [vmem:[%s1407_s0 + $0x1] ss:$16 sm:%s674_s17]   ;;  %710 = vrot.lane.b32.xlu1 %v709_v11, %s903_s5 }
  0x4d   :  { %v843_v13 = vld [vmem:[%s1407_s0 + $0x1] ss:$16 sm:%s679_s18]   ;;  %v677_v14 = vsel %vm7_vm0, %v842_v12, %v841_v10  ;;  %v14_v18 = vld [vmem:[%s1407_s0] ss:$16 sm:%s13_s27]  }
  0x4e   :  { %v844_v15 = vld [vmem:[%s1407_s0 + $0x1] ss:$16 sm:%s684_s23]   ;;  %v682_v16 = vsel %vm11_vm1, %v843_v13, %v677_v14  ;;  %v4_v20 = vld [vmem:[%s1407_s0] ss:$16 sm:%s3_s3]  }
  0x4f   :  { %v687_v19 = vsel %vm15_vm2, %v844_v15, %v682_v16  ;;  %v6_v21 = vld [vmem:[%s1407_s0] ss:$16 sm:%s5_s4]  }
  0x50   :  { %688 = vrot.lane.b32.xlu0 %v687_v19, %s903_s5  ;;  %v8_v22 = vsel %vm7_vm0, %v6_v21, %v4_v20  ;;  %v725_v23 = vld [vmem:[%s1407_s0 + $0x80] ss:$16 sm:%s20_s8]  }
  0x51   :  { %v12_v24 = vsel %vm11_vm1, %v10_v17, %v8_v22  ;;  %v726_v25 = vld [vmem:[%s1407_s0 + $0x80] ss:$16 sm:%s23_s13]  }
  0x52   :  { %v727_v26 = vld [vmem:[%s1407_s0 + $0x80] ss:$16 sm:%s28_s14]   ;;  %v16_v27 = vsel %vm15_vm2, %v14_v18, %v12_v24  ;;  %v26_v29 = vsel %vm7_vm0, %v726_v25, %v725_v23  ;;  %vm600_vm0 = vcmask 261312  }
  0x53   :  { %v728_v28 = vld [vmem:[%s1407_s0 + $0x80] ss:$16 sm:%s33_s19]   ;;  %18 = vst.msk [vmem:[#allocation0] sm:$0xff] %vm17_vm3, %v16_v27   ;;  %v31_v30 = vsel %vm11_vm1, %v727_v26, %v26_v29  ;;  %vm645_vm1 = vcmask 195712   ;;  %s904_s0 = smov [#allocation0]  }
  0x54   :  { %v36_v31 = vsel %vm15_vm2, %v728_v28, %v31_v30  ;;  %vm690_vm2 = vcmask 130112   ;;  %s719_s28 = sshll.u32 %s904_s0, 4  ;;  %s720_s28 = int_to_ptr.vmem [resolvable:$true] %s719_s28 }
  0x55   :  { %39 = vst.msk [vmem:[#allocation0 + $0x8] sm:$0xff] %vm17_vm3, %v36_v31   ;;  %s865_s29 = scalar_lea.vmem %s720_s28, 256  ;;  %p870_p1 = scmp.lt.s32.totalorder %s720_s28, %s720_s28 }
  0x56   :  { %p866_p0 = scmp.ne.s32.totalorder %s720_s28, %s865_s29  ;;  %p871_p2 = scmp.lt.s32.totalorder %s865_s29, %s865_s29 }
  0x58   :  { %p872_p3 = por %p871_p2, %p870_p1 }
  0x5a   :  { %p873_p4 = pnand %p872_p3, %p866_p0 }
  0x78   :  { %v104_v32 = vpop.permute.xlu1 %103  }
  0x7a   :  { %v59_v33 = vpop.permute.xlu0 %58  }
  0x7b   :  { %61 = vst.msk [vmem:[#allocation0] sm:$0xff] %vm60_vm4, %v59_v33  }
  0x7c   :  { %106 = vst.msk [vmem:[#allocation0] sm:$0xff] %vm105_vm5, %v104_v32  }
  0x7d   :  { %v126_v34 = vpop.permute.xlu1 %125  }
  0x80   :  { %v81_v35 = vpop.permute.xlu0 %80  }
  0x81   :  { %84 = vst.msk [vmem:[#allocation0 + $0x8] sm:$0xff] %vm60_vm4, %v81_v35  }
  0x82   :  { %129 = vst.msk [vmem:[#allocation0 + $0x8] sm:$0xff] %vm105_vm5, %v126_v34  }
  0x83   :  { %v171_v36 = vpop.permute.xlu1 %170  }
  0x84   :  { %174 = vst.msk [vmem:[#allocation0 + $0x8] sm:$0xff] %vm150_vm6, %v171_v36  }
  0x87   :  { %v149_v37 = vpop.permute.xlu0 %148   ;;  %v216_v38 = vpop.permute.xlu1 %215  }
  0x88   :  { %151 = vst.msk [vmem:[#allocation0] sm:$0xff] %vm150_vm6, %v149_v37  }
  0x89   :  { %219 = vst.msk [vmem:[#allocation0 + $0x8] sm:$0xff] %vm195_vm7, %v216_v38  }
  0x8b   :  { %v194_v39 = vpop.permute.xlu0 %193  }
  0x8c   :  { %196 = vst.msk [vmem:[#allocation0] sm:$0xff] %vm195_vm7, %v194_v39   ;;  %v261_v40 = vpop.permute.xlu1 %260  }
  0x8d   :  { %264 = vst.msk [vmem:[#allocation0 + $0x8] sm:$0xff] %vm240_vm8, %v261_v40  }
  0x90   :  { %v239_v41 = vpop.permute.xlu0 %238  }
  0x91   :  { %241 = vst.msk [vmem:[#allocation0] sm:$0xff] %vm240_vm8, %v239_v41   ;;  %v306_v42 = vpop.permute.xlu1 %305  }
  0x92   :  { %309 = vst.msk [vmem:[#allocation0 + $0x8] sm:$0xff] %vm285_vm9, %v306_v42  }
  0x95   :  { %v284_v43 = vpop.permute.xlu0 %283  }
  0x96   :  { %286 = vst.msk [vmem:[#allocation0] sm:$0xff] %vm285_vm9, %v284_v43   ;;  %v351_v44 = vpop.permute.xlu1 %350  }
  0x97   :  { %354 = vst.msk [vmem:[#allocation0 + $0x8] sm:$0xff] %vm330_vm10, %v351_v44  }
  0x9a   :  { %v329_v45 = vpop.permute.xlu0 %328  }
  0x9b   :  { %331 = vst.msk [vmem:[#allocation0] sm:$0xff] %vm330_vm10, %v329_v45   ;;  %v396_v46 = vpop.permute.xlu1 %395  }
  0x9c   :  { %399 = vst.msk [vmem:[#allocation0 + $0x8] sm:$0xff] %vm375_vm11, %v396_v46  }
  0x9f   :  { %v374_v47 = vpop.permute.xlu0 %373  }
  0xa0   :  { %376 = vst.msk [vmem:[#allocation0] sm:$0xff] %vm375_vm11, %v374_v47   ;;  %v441_v48 = vpop.permute.xlu1 %440  }
  0xa1   :  { %444 = vst.msk [vmem:[#allocation0 + $0x8] sm:$0xff] %vm420_vm12, %v441_v48  }
  0xa4   :  { %v419_v49 = vpop.permute.xlu0 %418  }
  0xa5   :  { %421 = vst.msk [vmem:[#allocation0] sm:$0xff] %vm420_vm12, %v419_v49   ;;  %v486_v50 = vpop.permute.xlu1 %485  }
  0xa6   :  { %489 = vst.msk [vmem:[#allocation0 + $0x8] sm:$0xff] %vm465_vm13, %v486_v50  }
  0xa9   :  { %v464_v51 = vpop.permute.xlu0 %463  }
  0xaa   :  { %466 = vst.msk [vmem:[#allocation0] sm:$0xff] %vm465_vm13, %v464_v51   ;;  %v531_v52 = vpop.permute.xlu1 %530  }
  0xab   :  { %534 = vst.msk [vmem:[#allocation0 + $0x8] sm:$0xff] %vm510_vm14, %v531_v52  }
  0xae   :  { %v509_v53 = vpop.permute.xlu0 %508  }
  0xaf   :  { %511 = vst.msk [vmem:[#allocation0] sm:$0xff] %vm510_vm14, %v509_v53   ;;  %v576_v54 = vpop.permute.xlu1 %575  }
  0xb0   :  { %579 = vst.msk [vmem:[#allocation0 + $0x8] sm:$0xff] %vm555_vm15, %v576_v54  }
  0xb3   :  { %v554_v55 = vpop.permute.xlu0 %553  }
  0xb4   :  { %556 = vst.msk [vmem:[#allocation0] sm:$0xff] %vm555_vm15, %v554_v55   ;;  %v621_v56 = vpop.permute.xlu1 %620  }
  0xb5   :  { %624 = vst.msk [vmem:[#allocation0 + $0x8] sm:$0xff] %vm600_vm0, %v621_v56  }
  0xb8   :  { %v599_v57 = vpop.permute.xlu0 %598  }
  0xb9   :  { %601 = vst.msk [vmem:[#allocation0] sm:$0xff] %vm600_vm0, %v599_v57   ;;  %v666_v58 = vpop.permute.xlu1 %665  }
  0xba   :  { %669 = vst.msk [vmem:[#allocation0 + $0x8] sm:$0xff] %vm645_vm1, %v666_v58  }
  0xbd   :  { %v644_v59 = vpop.permute.xlu0 %643  }
  0xbe   :  { %646 = vst.msk [vmem:[#allocation0] sm:$0xff] %vm645_vm1, %v644_v59   ;;  %v711_v60 = vpop.permute.xlu1 %710  }
  0xbf   :  { %714 = vst.msk [vmem:[#allocation0 + $0x8] sm:$0xff] %vm690_vm2, %v711_v60  }
  0xc2   :  { %v689_v61 = vpop.permute.xlu0 %688  }
  0xc3   :  { %691 = vst.msk [vmem:[#allocation0] sm:$0xff] %vm690_vm2, %v689_v61  }
  0xc4   :  { %876 = shalt.err (!%p873_p4)
}
  0xc5   :  { %s877_s3 = scalar_lea.hbm %s1408_s1, 256 }
  0xc6   :  { %p878_p5 = scmp.ne.s32.totalorder %s1408_s1, %s877_s3  ;;  %p881_p6 = scmp.lt.u32.totalorder %s877_s3, %s1408_s1 }
  0xc8   :  { %p883_p7 = pnand %p881_p6, %p878_p5 }
  0xca   :  { %886 = shalt.err (!%p883_p7)
}
  0xcb   :  { %722 = dma.vmem_to_hbm [thread:$0]  %s720_s28, 256, %s1408_s1, [#allocation1]  }
  0xcc   :  { %887 = dma.done.wait [#allocation1], 256  }
  0xcd   :  { %888 = vsyncadd [#allocation1], 4294967040 }
  0xce   :  { %724 = vsyncpa [#allocation1], 1 }

// kernel: feature_extractor_forward.1
= control target key start
LH: loop header
LB: loop body
LE: loop exit
PB: predicated region body
PF: predicated region fallthrough
CT: control target
= control target key end

     0   :  { %s3900_s24 = smov 0   ;;  %s4200_s0 = inlined_call_operand.vmem [shape: f32[2,8,384], index: 0, kind: input, shape index: {}]   ;;  %s4201_s1 = inlined_call_operand.vmem [shape: f32[8,72], index: 1, kind: input, shape index: {}]   ;;  %s4202_s2 = inlined_call_operand.vmem [shape: f32[8,1], index: 2, kind: input, shape index: {}]   ;;  %s4203_s3 = inlined_call_operand.vmem [shape: f32[8,1], index: 3, kind: input, shape index: {}]   ;;  %s4204_s4 = inlined_call_operand.vmem [shape: f32[1,272], index: 4, kind: input, shape index: {}]   ;;  %s4205_s5 = inlined_call_operand.vmem [shape: f32[16,72], index: 5, kind: input, shape index: {}]   ;;  %s4206_s6 = inlined_call_operand.vmem [shape: f32[16,1], index: 6, kind: input, shape index: {}]   ;;  %s4207_s7 = inlined_call_operand.vmem [shape: f32[2,16,324], index: 7, kind: output, shape index: {}]  }
   0x1 LB: > { %s3510_s25 = sadd.s32 4294967295, %s3832_s24   ;;  %p3514_p0 = scmp.ge.s32.totalorder %s3832_s24, 1  ;;  %s3832_s24 = sphi %s3900_s24, %s17_s24  }
   0x2   : > { %p237_p1 = scmp.lt.s32.totalorder %s3832_s24, 3 }
   0x4   : > { %p238_p2 = pnand %p3514_p0, %p237_p1 }
   0x5   : > { %p269_p3 = scmp.lt.s32.totalorder (!%p238_p2), %s3510_s25, 1  ;;  %v3834_v0 = vmov (!%p238_p2), 0.0   ;;  %vm3835_vm0 = vmmov (!%p238_p2), 0   ;;  %s3836_s30 = smov (!%p238_p2), 127   ;;  %v3933_v4 = vld [vmem:[%s4201_s1] sm:$0xff] (!%p238_p2)  ;;  %v3851_v5 = vmov (!%p238_p2), 0  }
   0x6   : > { %241 = sbr.rel (%p238_p2) target bundleno = 1210 (0x4ba), region = 48  ;;  %3618 = vmatprep.subr.mxu1 (!%p238_p2), %v3834_v0  ;;  %1770 = vst [vmem:[#allocation3] sm:$0xff] (!%p238_p2), %v3834_v0  ;;  %1772 = vst [vmem:[#allocation3 + $0x10] sm:$0xff] (!%p238_p2), %v3834_v0  ;;  %3620 = vmatprep.mubr.msk.f32.mxu1 (!%p238_p2), %vm3835_vm0, %v3834_v0  ;;  %s3837_s10 = smov (!%p238_p2), 120   ;;  %v1708_v6 = vld [vmem:[%s4202_s2] sm:$0xff] (!%p238_p2)  ;;  %vm295_vm1 = vcmask (!%p238_p2), 1039360  }
   0x7   : > { %368 = vmatprep.mubr.f32.mxu0 (!%p238_p2), %v3834_v0  ;;  %s3838_s11 = smov (!%p238_p2), 126   ;;  %s3839_s12 = smov (!%p238_p2), 112   ;;  %3824 = vset.pattern.permute.xlu0 (!%p238_p2), %v3851_v5  ;;  %v1717_v7 = vld [vmem:[%s4203_s3] sm:$0xff] (!%p238_p2)  ;;  %vm301_vm2 = vcmask (!%p238_p2), 64512   ;;  %vm596_vm3 = vcmask (!%p238_p2), 1031168   ;;  %vm756_vm4 = vcmask (!%p238_p2), 900096  }
   0x8   : > { %s3840_s13 = smov (!%p238_p2), 110   ;;  %s3841_s14 = smov (!%p238_p2), 104   ;;  %3825 = vset.pattern.permute.xlu1 (!%p238_p2), %v3851_v5  ;;  %vm916_vm5 = vcmask (!%p238_p2), 891904   ;;  %vm1076_vm6 = vcmask (!%p238_p2), 883712   ;;  %vm1236_vm7 = vcmask (!%p238_p2), 752640   ;;  %vm1396_vm8 = vcmask (!%p238_p2), 744448  }
   0x9   : > { %s3842_s15 = smov (!%p238_p2), 109   ;;  %s3843_s16 = smov (!%p238_p2), 96   ;;  %vm1556_vm9 = vcmask (!%p238_p2), 736256   ;;  %vm1731_vm10 = vcmask (!%p238_p2), 326656   ;;  %vm1808_vm11 = vcmask (!%p238_p2), 1047872   ;;  %vm1811_vm12 = vcmask (!%p238_p2), 457728  }
   0xa   : > { %s3844_s17 = smov (!%p238_p2), 108   ;;  %s3845_s18 = smov (!%p238_p2), 88   ;;  %vm1833_vm13 = vcmask (!%p238_p2), 1014784   ;;  %vm2172_vm14 = vcmask (!%p238_p2), 998400   ;;  %vm2527_vm15 = vcmask (!%p238_p2), 719872  }
   0xb   : > { %s3846_s19 = smov (!%p238_p2), 92   ;;  %s3847_s20 = smov (!%p238_p2), 80  }
   0xc   : > { %s3848_s21 = smov (!%p238_p2), 91   ;;  %s3849_s22 = smov (!%p238_p2), 72  }
   0xd   : > { %s4209_s25 = smov (!%p269_p3, %s3510_s25), 1  ;;  %s3850_s23 = smov 90  }
   0xe   : > { %s3788_s26 = smul.u32 24, %s4209_s25  ;;  %s3854_s27 = smov 124  }
   0xf   : > { %s3855_s28 = smov 122  }
  0x10   : > { %s273_s29 = scalar_lea.vmem %s4200_s0, %s3788_s26  ;;  %s3852_s26 = smov 64  }
  0x11   : > { %v3920_v1 = vld [vmem:[%s273_s29 + $0x8] sm:$0xff]  ;;  %v3922_v2 = vld [vmem:[%s273_s29] sm:$0xff]  ;;  %v3928_v3 = vld [vmem:[%s273_s29 + $0x10] sm:$0xff] }
  0x12   : > { %291 = vrot.lane.b32.xlu0 %v3920_v1, %s3836_s30  ;;  %289 = vrot.lane.b32.xlu1 %v3922_v2, %s3836_s30 }
  0x16   : > { %293 = vrot.lane.b32.xlu0 %v3928_v3, %s3836_s30  ;;  %284 = vrot.lane.b32.xlu1 %v3933_v4, %s3837_s10 }
  0x1a   : > { %592 = vrot.lane.b32.xlu0 %v3920_v1, %s3838_s11  ;;  %594 = vrot.lane.b32.xlu1 %v3928_v3, %s3838_s11 }
  0x1e   : > { %590 = vrot.lane.b32.xlu0 %v3922_v2, %s3838_s11  ;;  %588 = vrot.lane.b32.xlu1 %v3933_v4, %s3839_s12 }
  0x22   : > { %752 = vrot.lane.b32.xlu0 %v3920_v1, %s3840_s13  ;;  %754 = vrot.lane.b32.xlu1 %v3928_v3, %s3840_s13 }
  0x26   : > { %750 = vrot.lane.b32.xlu0 %v3922_v2, %s3840_s13  ;;  %748 = vrot.lane.b32.xlu1 %v3933_v4, %s3841_s14 }
  0x2a   : > { %912 = vrot.lane.b32.xlu0 %v3920_v1, %s3842_s15  ;;  %914 = vrot.lane.b32.xlu1 %v3928_v3, %s3842_s15 }
  0x2e   : > { %910 = vrot.lane.b32.xlu0 %v3922_v2, %s3842_s15  ;;  %908 = vrot.lane.b32.xlu1 %v3933_v4, %s3843_s16 }
  0x32   : > { %1072 = vrot.lane.b32.xlu0 %v3920_v1, %s3844_s17  ;;  %1074 = vrot.lane.b32.xlu1 %v3928_v3, %s3844_s17 }
  0x36   : > { %1070 = vrot.lane.b32.xlu0 %v3922_v2, %s3844_s17  ;;  %1068 = vrot.lane.b32.xlu1 %v3933_v4, %s3845_s18 }
  0x3a   : > { %1232 = vrot.lane.b32.xlu0 %v3920_v1, %s3846_s19  ;;  %1234 = vrot.lane.b32.xlu1 %v3928_v3, %s3846_s19 }
  0x3e   : > { %1230 = vrot.lane.b32.xlu0 %v3922_v2, %s3846_s19  ;;  %1228 = vrot.lane.b32.xlu1 %v3933_v4, %s3847_s20 }
  0x42   : > { %1392 = vrot.lane.b32.xlu0 %v3920_v1, %s3848_s21  ;;  %1394 = vrot.lane.b32.xlu1 %v3928_v3, %s3848_s21 }
  0x46   : > { %1390 = vrot.lane.b32.xlu0 %v3922_v2, %s3848_s21  ;;  %1388 = vrot.lane.b32.xlu1 %v3933_v4, %s3849_s22 }
  0x4a   : > { %1552 = vrot.lane.b32.xlu0 %v3920_v1, %s3850_s23  ;;  %1554 = vrot.lane.b32.xlu1 %v3928_v3, %s3850_s23 }
  0x4e   : > { %1550 = vrot.lane.b32.xlu0 %v3922_v2, %s3850_s23  ;;  %1548 = vrot.lane.b32.xlu1 %v3933_v4, %s3852_s26 }
  0x52   : > { %1711 = vperm.xlu0 %3824, %v1708_v6   ;;  %1720 = vperm.xlu1 %3825, %v1717_v7  }
  0x84   : > { %v292_v8 = vpop.permute.xlu0 %291  ;;  %v290_v9 = vpop.permute.xlu1 %289 }
  0x85   : > { %v296_v13 = vsel %vm295_vm1, %v290_v9, %v292_v8 }
  0x88   : > { %v294_v10 = vpop.permute.xlu0 %293  ;;  %v285_v11 = vpop.permute.xlu1 %284 }
  0x89   : > { %3619 = vmatpush3.msra.mxu1 %v294_v10  ;;  %v297_v12 = vsel %vm295_vm1, %v292_v8, %v294_v10 }
  0x8a   : > { %304 = vmatprep.subr.mxu0 %v297_v12  ;;  %3621 = vmatmul.mubr.msk.f32.vlgmr.msra.gmra.mrb[0].mxu1 %vm301_vm2, %v285_v11 }
  0x8b   : > { %305 = vmatpush1.msra.mxu0 %v296_v13  ;;  %3623 = vmatprep.subr.mxu1 %v3834_v0 }
  0x8c   : > { %3517 = vmatmul.mubr.msk.f32.vlgmr.msra.gmra.mrb[0].mxu0 %vm301_vm2, %v285_v11  ;;  %v593_v14 = vpop.permute.xlu0 %592  ;;  %3624 = vmatpush3.msra.mxu1 %v3928_v3  ;;  %v595_v15 = vpop.permute.xlu1 %594 }
  0x8d   : > { %3625 = vmatprep.mubr.msk.f32.mxu1 %vm3835_vm0, %v3834_v0  ;;  %447 = vmatprep.subr.mxu0 %v3920_v1  ;;  %v598_v16 = vsel %vm596_vm3, %v593_v14, %v595_v15 }
  0x8e   : > { %448 = vmatpush1.msra.mxu0 %v3922_v2  ;;  %511 = vmatprep.mubr.f32.mxu0 %v3834_v0 }
  0x8f   : > { %604 = vmatprep.subr.mxu0 %v598_v16  ;;  %3628 = vmatprep.subr.mxu1 %v3834_v0 }
  0x90   : > { %v591_v17 = vpop.permute.xlu0 %590  ;;  %v589_v18 = vpop.permute.xlu1 %588 }
  0x91   : > { %v597_v19 = vsel %vm596_vm3, %v591_v17, %v593_v14  ;;  %v1776_v17 = vlaneseq }
  0x92   : > { %3626 = vmatmul.mubr.msk.f32.vlgmr.msra.gmra.mrb[0].mxu1 %vm301_vm2, %v3933_v4 }
  0x93   : > { %3629 = vmatpush3.msra.mxu1 %v595_v15  ;;  %3630 = vmatprep.mubr.msk.f32.mxu1 %vm3835_vm0, %v3834_v0 }
  0x94   : > { %3519 = vmatmul.mubr.msk.f32.vlgmr.msra.gmra.mrb[0].mxu0 %vm301_vm2, %v3933_v4  ;;  %v753_v20 = vpop.permute.xlu0 %752  ;;  %v755_v21 = vpop.permute.xlu1 %754  ;;  %3633 = vmatprep.subr.mxu1 %v3834_v0 }
  0x95   : > { %605 = vmatpush1.msra.mxu0 %v597_v19  ;;  %668 = vmatprep.mubr.f32.mxu0 %v3834_v0  ;;  %v758_v22 = vsel %vm756_vm4, %v753_v20, %v755_v21 }
  0x96   : > { %764 = vmatprep.subr.mxu0 %v758_v22  ;;  %v1774_v22 = vld [vmem:[%s4204_s4] sm:$0x7] }
  0x98   : > { %v751_v23 = vpop.permute.xlu0 %750  ;;  %v749_v24 = vpop.permute.xlu1 %748 }
  0x99   : > { %v757_v25 = vsel %vm756_vm4, %v751_v23, %v753_v20 }
  0x9a   : > { %3631 = vmatmul.mubr.msk.f32.vlgmr.msra.gmra.mrb[0].mxu1 %vm301_vm2, %v589_v18 }
  0x9b   : > { %3634 = vmatpush3.msra.mxu1 %v755_v21  ;;  %3635 = vmatprep.mubr.msk.f32.mxu1 %vm3835_vm0, %v3834_v0 }
  0x9c   : > { %3521 = vmatmul.mubr.msk.f32.vlgmr.msra.gmra.mrb[0].mxu0 %vm301_vm2, %v589_v18  ;;  %v913_v26 = vpop.permute.xlu0 %912  ;;  %v915_v27 = vpop.permute.xlu1 %914  ;;  %3638 = vmatprep.subr.mxu1 %v3834_v0  ;;  %v1777_v18 = vshrl.u32 %v1776_v17, 7 }
  0x9d   : > { %765 = vmatpush1.msra.mxu0 %v757_v25  ;;  %828 = vmatprep.mubr.f32.mxu0 %v3834_v0  ;;  %v918_v28 = vsel %vm916_vm5, %v913_v26, %v915_v27 }
  0x9e   : > { %924 = vmatprep.subr.mxu0 %v918_v28  ;;  %v1778_v20 = vsub.s32 0, %v1777_v18  ;;  %v1782_v21 = vsub.s32 1, %v1777_v18  ;;  %v1786_v25 = vsub.s32 2, %v1777_v18 }
  0xa0   : > { %v911_v29 = vpop.permute.xlu0 %910  ;;  %v909_v30 = vpop.permute.xlu1 %908 }
  0xa1   : > { %v917_v31 = vsel %vm916_vm5, %v911_v29, %v913_v26  ;;  %v1779_v26 = vrot.slane %v1774_v22, %v1778_v20 }
  0xa2   : > { %3636 = vmatmul.mubr.msk.f32.vlgmr.msra.gmra.mrb[0].mxu1 %vm301_vm2, %v749_v24 }
  0xa3   : > { %3639 = vmatpush3.msra.mxu1 %v915_v27  ;;  %3640 = vmatprep.mubr.msk.f32.mxu1 %vm3835_vm0, %v3834_v0  ;;  %v1783_v27 = vrot.slane %v1774_v22, %v1782_v21 }
  0xa4   : > { %3523 = vmatmul.mubr.msk.f32.vlgmr.msra.gmra.mrb[0].mxu0 %vm301_vm2, %v749_v24  ;;  %v1073_v32 = vpop.permute.xlu0 %1072  ;;  %v1075_v33 = vpop.permute.xlu1 %1074  ;;  %3643 = vmatprep.subr.mxu1 %v3834_v0 }
  0xa5   : > { %925 = vmatpush1.msra.mxu0 %v917_v31  ;;  %988 = vmatprep.mubr.f32.mxu0 %v3834_v0  ;;  %v1078_v34 = vsel %vm1076_vm6, %v1073_v32, %v1075_v33 }
  0xa6   : > { %1084 = vmatprep.subr.mxu0 %v1078_v34 }
  0xa8   : > { %v1071_v35 = vpop.permute.xlu0 %1070  ;;  %v1069_v36 = vpop.permute.xlu1 %1068 }
  0xa9   : > { %v1077_v37 = vsel %vm1076_vm6, %v1071_v35, %v1073_v32  ;;  %v1787_v32 = vrot.slane %v1774_v22, %v1786_v25 }
  0xaa   : > { %3641 = vmatmul.mubr.msk.f32.vlgmr.msra.gmra.mrb[0].mxu1 %vm301_vm2, %v909_v30 }
  0xab   : > { %3644 = vmatpush3.msra.mxu1 %v1075_v33  ;;  %3645 = vmatprep.mubr.msk.f32.mxu1 %vm3835_vm0, %v3834_v0 }
  0xac   : > { %3525 = vmatmul.mubr.msk.f32.vlgmr.msra.gmra.mrb[0].mxu0 %vm301_vm2, %v909_v30  ;;  %v1233_v38 = vpop.permute.xlu0 %1232  ;;  %v1235_v39 = vpop.permute.xlu1 %1234  ;;  %3648 = vmatprep.subr.mxu1 %v3834_v0 }
  0xad   : > { %1085 = vmatpush1.msra.mxu0 %v1077_v37  ;;  %1148 = vmatprep.mubr.f32.mxu0 %v3834_v0  ;;  %v1238_v40 = vsel %vm1236_vm7, %v1233_v38, %v1235_v39 }
  0xae   : > { %1244 = vmatprep.subr.mxu0 %v1238_v40 }
  0xb0   : > { %v1231_v41 = vpop.permute.xlu0 %1230  ;;  %v1229_v42 = vpop.permute.xlu1 %1228 }
  0xb1   : > { %v1237_v43 = vsel %vm1236_vm7, %v1231_v41, %v1233_v38  ;;  %v4078_v38 = vld [vmem:[%s4205_s5] sm:$0xff] }
  0xb2   : > { %3646 = vmatmul.mubr.msk.f32.vlgmr.msra.gmra.mrb[0].mxu1 %vm301_vm2, %v1069_v36 }
  0xb3   : > { %3649 = vmatpush3.msra.mxu1 %v1235_v39  ;;  %3650 = vmatprep.mubr.msk.f32.mxu1 %vm3835_vm0, %v3834_v0 }
  0xb4   : > { %3527 = vmatmul.mubr.msk.f32.vlgmr.msra.gmra.mrb[0].mxu0 %vm301_vm2, %v1069_v36  ;;  %v1393_v44 = vpop.permute.xlu0 %1392  ;;  %v1395_v45 = vpop.permute.xlu1 %1394  ;;  %3653 = vmatprep.subr.mxu1 %v3834_v0  ;;  %v4071_v36 = vld [vmem:[%s4205_s5 + $0x8] sm:$0xff] }
  0xb5   : > { %1245 = vmatpush1.msra.mxu0 %v1237_v43  ;;  %1308 = vmatprep.mubr.f32.mxu0 %v3834_v0  ;;  %v1398_v46 = vsel %vm1396_vm8, %v1393_v44, %v1395_v45 }
  0xb6   : > { %1404 = vmatprep.subr.mxu0 %v1398_v46  ;;  %v3424_v46 = vld [vmem:[%s4206_s6] sm:$0xff] }
  0xb8   : > { %v1391_v47 = vpop.permute.xlu0 %1390  ;;  %v1389_v48 = vpop.permute.xlu1 %1388 }
  0xb9   : > { %v1397_v49 = vsel %vm1396_vm8, %v1391_v47, %v1393_v44  ;;  %v3425_v47 = vld [vmem:[%s4206_s6 + $0x8] sm:$0xff] }
  0xba   : > { %3651 = vmatmul.mubr.msk.f32.vlgmr.msra.gmra.mrb[0].mxu1 %vm301_vm2, %v1229_v42 }
  0xbb   : > { %3654 = vmatpush3.msra.mxu1 %v1395_v45  ;;  %3655 = vmatprep.mubr.msk.f32.mxu1 %vm3835_vm0, %v3834_v0 }
  0xbc   : > { %3529 = vmatmul.mubr.msk.f32.vlgmr.msra.gmra.mrb[0].mxu0 %vm301_vm2, %v1229_v42  ;;  %v1553_v50 = vpop.permute.xlu0 %1552  ;;  %v1555_v51 = vpop.permute.xlu1 %1554  ;;  %3658 = vmatprep.subr.mxu1 %v3834_v0 }
  0xbd   : > { %1405 = vmatpush1.msra.mxu0 %v1397_v49  ;;  %1468 = vmatprep.mubr.f32.mxu0 %v3834_v0  ;;  %v1558_v52 = vsel %vm1556_vm9, %v1553_v50, %v1555_v51 }
  0xbe   : > { %1564 = vmatprep.subr.mxu0 %v1558_v52 }
  0xc0   : > { %v1551_v53 = vpop.permute.xlu0 %1550  ;;  %v1549_v55 = vpop.permute.xlu1 %1548 }
  0xc1   : > { %v1557_v54 = vsel %vm1556_vm9, %v1551_v53, %v1553_v50 }
  0xc2   : > { %3656 = vmatmul.mubr.msk.f32.vlgmr.msra.gmra.mrb[0].mxu1 %vm301_vm2, %v1389_v48 }
  0xc3   : > { %3659 = vmatpush3.msra.mxu1 %v1555_v51  ;;  %3660 = vmatprep.mubr.msk.f32.mxu1 %vm3835_vm0, %v3834_v0  ;;  %vm2705_vm0 = vcmask 703488  }
  0xc4   : > { %3531 = vmatmul.mubr.msk.f32.vlgmr.msra.gmra.mrb[0].mxu0 %vm301_vm2, %v1389_v48 }
  0xc5   : > { %1565 = vmatpush1.msra.mxu0 %v1557_v54  ;;  %1628 = vmatprep.mubr.f32.mxu0 %v3834_v0 }
  0xca   : > { %3661 = vmatmul.mubr.msk.f32.vlgmr.msra.gmra.mrb[0].mxu1 %vm301_vm2, %v1549_v55 }
  0xcb   : > { %1907 = vmatprep.mubr.f32.mxu1 %v3834_v0 }
  0xcc   : > { %3533 = vmatmul.mubr.msk.f32.vlgmr.msra.gmra.mrb[0].mxu0 %vm301_vm2, %v1549_v55 }
  0xcd   : > { %2246 = vmatprep.mubr.f32.mxu0 %v3834_v0 }
  0xd1   : > { %v1712_v56 = vpop.permute.xlu0 %1711  ;;  %v1721_v58 = vpop.permute.xlu1 %1720 }
 0x19d   : > { %v1701_v57 = vpop.f32.mrb[0].mxu1 }
 0x19e   : > { %v1716_v59 = vmul.f32 %v1712_v56, %v1701_v57  ;;  %v3662_v60 = vpop.f32.mrb[1].mxu1 }
 0x19f   : > { %v1630_v61 = vpop.f32.mrb[0].mxu0 }
 0x1a0   : > { %v1714_v62 = vmul.f32 %v1712_v56, %v1630_v61  ;;  %v1725_v63 = vadd.f32 %v1721_v58, %v1716_v59  ;;  %v1632_v1 = vpop.f32.mrb[1].mxu0 }
 0x1a1   : > { %v1715_v2 = vmul.f32 %v1712_v56, %v1632_v1 }
 0x1a2   : > { %v1723_v3 = vadd.f32 %v1721_v58, %v1714_v62  ;;  %v1728_v4 = vmax.f32 %v1725_v63, 0.0 }
 0x1a3   : > { %v1724_v5 = vadd.f32 %v1721_v58, %v1715_v2 }
 0x1a4   : > { %v1726_v6 = vmax.f32 %v1723_v3, 0.0  ;;  %1732 = vst.msk [vmem:[#allocation2 + $0x10] sm:$0xff] %vm1731_vm10, %v1728_v4 }
 0x1a5   : > { %v1727_v7 = vmax.f32 %v1724_v5, 0.0 }
 0x1a6   : > { %1739 = vrot.lane.b32.xlu1 %v1726_v6, %s3836_s30 }
 0x1a7   : > { %1741 = vrot.lane.b32.xlu0 %v1727_v7, %s3836_s30 }
 0x1ab   : > { %v1735_v8 = vld [vmem:[#allocation2 + $0x10] sm:$0xff] }
 0x1ac   : > { %1743 = vrot.lane.b32.xlu1 %v1735_v8, %s3836_s30 }
 0x218   : > { %v1740_v9 = vpop.permute.xlu1 %1739 }
 0x219   : > { %v1742_v10 = vpop.permute.xlu0 %1741 }
 0x21a   : > { %v1745_v11 = vsel %vm295_vm1, %v1740_v9, %v1742_v10 }
 0x21b   : > { %v1750_v12 = vmax.f32 %v1726_v6, %v1745_v11 }
 0x21d   : > { %1756 = vrot.lane.b32.xlu0 %v1750_v12, %s3840_s13 }
 0x21e   : > { %v1744_v13 = vpop.permute.xlu1 %1743 }
 0x21f   : > { %v1746_v14 = vsel %vm295_vm1, %v1742_v10, %v1744_v13  ;;  %v1752_v15 = vmax.f32 %v1735_v8, %v1744_v13  ;;  %vm2893_vm1 = vcmask 441344  }
 0x220   : > { %v1751_v16 = vmax.f32 %v1727_v7, %v1746_v14 }
 0x221   : > { %1760 = vrot.lane.b32.xlu0 %v1752_v15, %s3840_s13 }
 0x222   : > { %1758 = vrot.lane.b32.xlu1 %v1751_v16, %s3840_s13  ;;  %s3853_s13 = smov 40  }
 0x28f   : > { %v1757_v19 = vpop.permute.xlu0 %1756 }
 0x293   : > { %v1761_v23 = vpop.permute.xlu0 %1760 }
 0x294   : > { %v1759_v24 = vpop.permute.xlu1 %1758  ;;  %v1769_v33 = vmax.f32 %v1752_v15, %v1761_v23 }
 0x295   : > { %v1762_v28 = vsel %vm756_vm4, %v1757_v19, %v1759_v24  ;;  %v1763_v29 = vsel %vm756_vm4, %v1759_v24, %v1761_v23  ;;  %vm3255_vm4 = vcmask 408576  }
 0x296   : > { %v1767_v30 = vmax.f32 %v1750_v12, %v1762_v28  ;;  %v1768_v31 = vmax.f32 %v1751_v16, %v1763_v29  ;;  %v1793_v37 = vmul.f32 %v1787_v32, %v1769_v33 }
 0x298   : > { %v1791_v34 = vmul.f32 %v1779_v26, %v1767_v30  ;;  %v1792_v35 = vmul.f32 %v1783_v27, %v1768_v31 }
 0x29a   : > { %1797 = vrot.lane.b32.xlu1 %v1791_v34, %s3853_s13  ;;  %1799 = vrot.lane.b32.xlu0 %v1792_v35, %s3853_s13 }
 0x29e   : > { %1801 = vrot.lane.b32.xlu1 %v1793_v37, %s3853_s13  ;;  %1822 = vrot.lane.b32.xlu0 %v4071_v36, %s3837_s10 }
 0x2a2   : > { %1820 = vrot.lane.b32.xlu1 %v4078_v38, %s3837_s10  ;;  %s3856_s10 = smov 86  }
 0x30c   : > { %v1798_v39 = vpop.permute.xlu1 %1797  ;;  %v1800_v40 = vpop.permute.xlu0 %1799 }
 0x30d   : > { %1809 = vst.msk [vmem:[#allocation3] sm:$0xff] %vm1808_vm11, %v1798_v39  ;;  %v1803_v41 = vsel %vm1731_vm10, %v1798_v39, %v1800_v40 }
 0x310   : > { %v1802_v42 = vpop.permute.xlu1 %1801  ;;  %v1823_v48 = vpop.permute.xlu0 %1822 }
 0x311   : > { %v1804_v43 = vsel %vm1731_vm10, %v1800_v40, %v1802_v42 }
 0x312   : > { %1812 = vst.msk [vmem:[#allocation3 + $0x10] sm:$0xff] %vm1811_vm12, %v1804_v43 }
 0x314   : > { %v1815_v44 = vld [vmem:[#allocation3] sm:$0xff]  ;;  %v1821_v49 = vpop.permute.xlu1 %1820 }
 0x315   : > { %1995 = vrot.lane.b32.xlu1 %v1815_v44, %s3838_s11  ;;  %1827 = vrot.lane.b32.xlu0 %v1815_v44, %s3854_s27 }
 0x319   : > { %2166 = vrot.lane.b32.xlu0 %v1815_v44, %s3855_s28  ;;  %v1817_v45 = vld [vmem:[#allocation3 + $0x10] sm:$0xff] }
 0x31a   : > { %1831 = vrot.lane.b32.xlu1 %v1817_v45, %s3854_s27 }
 0x31d   : > { %1829 = vrot.lane.b32.xlu0 %v1803_v41, %s3854_s27 }
 0x31e   : > { %2162 = vrot.lane.b32.xlu1 %v4078_v38, %s3839_s12 }
 0x321   : > { %2164 = vrot.lane.b32.xlu0 %v4071_v36, %s3839_s12  ;;  %s3858_s12 = smov 52  }
 0x322   : > { %2344 = vrot.lane.b32.xlu1 %v1815_v44, %s3850_s23 }
 0x325   : > { %2340 = vrot.lane.b32.xlu0 %v4078_v38, %s3841_s14 }
 0x326   : > { %1997 = vrot.lane.b32.xlu1 %v1803_v41, %s3838_s11 }
 0x329   : > { %1999 = vrot.lane.b32.xlu0 %v1817_v45, %s3838_s11  ;;  %s3857_s11 = smov 54  }
 0x32a   : > { %2342 = vrot.lane.b32.xlu1 %v4071_v36, %s3841_s14  ;;  %s3859_s14 = smov 50  }
 0x32d   : > { %2521 = vrot.lane.b32.xlu0 %v1815_v44, %s3845_s18 }
 0x32e   : > { %2517 = vrot.lane.b32.xlu1 %v4078_v38, %s3843_s16 }
 0x331   : > { %2168 = vrot.lane.b32.xlu0 %v1803_v41, %s3855_s28 }
 0x332   : > { %2170 = vrot.lane.b32.xlu1 %v1817_v45, %s3855_s28 }
 0x335   : > { %2519 = vrot.lane.b32.xlu0 %v4071_v36, %s3843_s16 }
 0x336   : > { %2699 = vrot.lane.b32.xlu1 %v1815_v44, %s3856_s10 }
 0x339   : > { %2348 = vrot.lane.b32.xlu0 %v1817_v45, %s3850_s23 }
 0x33a   : > { %2346 = vrot.lane.b32.xlu1 %v1803_v41, %s3850_s23 }
 0x33d   : > { %2695 = vrot.lane.b32.xlu0 %v4078_v38, %s3845_s18 }
 0x33e   : > { %2697 = vrot.lane.b32.xlu1 %v4071_v36, %s3845_s18 }
 0x341   : > { %2523 = vrot.lane.b32.xlu0 %v1803_v41, %s3845_s18 }
 0x342   : > { %2525 = vrot.lane.b32.xlu1 %v1817_v45, %s3845_s18 }
 0x345   : > { %2885 = vrot.lane.b32.xlu0 %v1815_v44, %s3857_s11 }
 0x346   : > { %2877 = vrot.lane.b32.xlu1 %v4078_v38, %s3847_s20 }
 0x349   : > { %2703 = vrot.lane.b32.xlu0 %v1817_v45, %s3856_s10 }
 0x34a   : > { %2701 = vrot.lane.b32.xlu1 %v1803_v41, %s3856_s10 }
 0x34d   : > { %2891 = vrot.lane.b32.xlu0 %v3834_v0, %s3857_s11 }
 0x34e   : > { %2879 = vrot.lane.b32.xlu1 %v4071_v36, %s3847_s20 }
 0x351   : > { %2887 = vrot.lane.b32.xlu0 %v1803_v41, %s3857_s11 }
 0x352   : > { %2889 = vrot.lane.b32.xlu1 %v1817_v45, %s3857_s11 }
 0x355   : > { %3066 = vrot.lane.b32.xlu0 %v1815_v44, %s3858_s12 }
 0x356   : > { %3062 = vrot.lane.b32.xlu1 %v4078_v38, %s3849_s22 }
 0x359   : > { %3068 = vrot.lane.b32.xlu0 %v1803_v41, %s3858_s12 }
 0x35a   : > { %3070 = vrot.lane.b32.xlu1 %v1817_v45, %s3858_s12 }
 0x35d   : > { %3072 = vrot.lane.b32.xlu0 %v3834_v0, %s3858_s12 }
 0x35e   : > { %3064 = vrot.lane.b32.xlu1 %v4071_v36, %s3849_s22  ;;  %s3789_s22 = smul.u32 48, %s4209_s25 }
 0x360   : > { %s278_s8 = scalar_lea.vmem %s4207_s7, %s3789_s22 }
 0x361   : > { %3249 = vrot.lane.b32.xlu0 %v1803_v41, %s3859_s14 }
 0x362   : > { %3251 = vrot.lane.b32.xlu1 %v1817_v45, %s3859_s14 }
 0x365   : > { %3247 = vrot.lane.b32.xlu0 %v1815_v44, %s3859_s14 }
 0x366   : > { %3243 = vrot.lane.b32.xlu1 %v4078_v38, %s3852_s26 }
 0x369   : > { %3253 = vrot.lane.b32.xlu0 %v3834_v0, %s3859_s14 }
 0x36a   : > { %3245 = vrot.lane.b32.xlu1 %v4071_v36, %s3852_s26 }
 0x36d   : > { %3428 = vperm.xlu0 %3824, %v3424_v46  }
 0x36e   : > { %3433 = vperm.xlu1 %3825, %v3425_v47  }
 0x387   : > { %v1828_v50 = vpop.permute.xlu0 %1827  ;;  %v1996_v51 = vpop.permute.xlu1 %1995 }
 0x38b   : > { %v2167_v52 = vpop.permute.xlu0 %2166 }
 0x38c   : > { %v1832_v53 = vpop.permute.xlu1 %1831 }
 0x38f   : > { %v1830_v54 = vpop.permute.xlu0 %1829 }
 0x390   : > { %v1834_v55 = vsel %vm1833_vm13, %v1828_v50, %v1830_v54  ;;  %v2163_v56 = vpop.permute.xlu1 %2162  ;;  %v1835_v57 = vsel %vm1833_vm13, %v1830_v54, %v1832_v53 }
 0x391   : > { %1843 = vmatprep.subr.mxu1 %v1835_v57 }
 0x392   : > { %1844 = vmatpush1.msra.mxu1 %v1834_v55 }
 0x393   : > { %v2165_v58 = vpop.permute.xlu0 %2164  ;;  %3535 = vmatmul.mubr.msk.f32.vlgmr.msra.gmra.mrb[2].mxu1 %vm301_vm2, %v1821_v49  ;;  %3663 = vmatprep.subr.mxu1 %v1832_v53 }
 0x394   : > { %3664 = vmatpush3.msra.mxu1 %v1832_v53  ;;  %v2345_v59 = vpop.permute.xlu1 %2344  ;;  %1913 = vmatprep.mubr.f32.mxu1 %v3834_v0 }
 0x397   : > { %v2341_v60 = vpop.permute.xlu0 %2340  ;;  %3536 = vmatmul.mubr.msk.f32.gmra.mrb[4].mxu1 %vm301_vm2, %v1823_v48 }
 0x398   : > { %3665 = vmatprep.mubr.msk.f32.mxu1 %vm301_vm2, %v1821_v49  ;;  %v1998_v61 = vpop.permute.xlu1 %1997 }
 0x399   : > { %v2001_v2 = vsel %vm596_vm3, %v1996_v51, %v1998_v61 }
 0x39b   : > { %v2000_v62 = vpop.permute.xlu0 %1999  ;;  %3666 = vmatmul.mubr.msk.f32.vlgmr.msra.gmra.mrb[6].mxu1 %vm301_vm2, %v1823_v48 }
 0x39c   : > { %v2343_v63 = vpop.permute.xlu1 %2342  ;;  %v2002_v1 = vsel %vm596_vm3, %v1998_v61, %v2000_v62  ;;  %2074 = vmatprep.mubr.f32.mxu1 %v3834_v0  ;;  %vm3074_vm3 = vcmask 424960  }
 0x39d   : > { %2010 = vmatprep.subr.mxu1 %v2002_v1 }
 0x39e   : > { %2011 = vmatpush1.msra.mxu1 %v2001_v2 }
 0x39f   : > { %v2522_v3 = vpop.permute.xlu0 %2521  ;;  %3539 = vmatmul.mubr.msk.f32.vlgmr.msra.gmra.mrb[2].mxu1 %vm301_vm2, %v4078_v38  ;;  %3668 = vmatprep.subr.mxu1 %v2000_v62 }
 0x3a0   : > { %3669 = vmatpush3.msra.mxu1 %v2000_v62  ;;  %v2518_v4 = vpop.permute.xlu1 %2517  ;;  %2080 = vmatprep.mubr.f32.mxu1 %v3834_v0 }
 0x3a3   : > { %v2169_v5 = vpop.permute.xlu0 %2168  ;;  %3540 = vmatmul.mubr.msk.f32.gmra.mrb[4].mxu1 %vm301_vm2, %v4071_v36 }
 0x3a4   : > { %v2171_v6 = vpop.permute.xlu1 %2170  ;;  %3670 = vmatprep.mubr.msk.f32.mxu1 %vm301_vm2, %v4078_v38  ;;  %v2173_v8 = vsel %vm2172_vm14, %v2167_v52, %v2169_v5 }
 0x3a5   : > { %3673 = vmatprep.subr.mxu1 %v2171_v6  ;;  %v2174_v7 = vsel %vm2172_vm14, %v2169_v5, %v2171_v6 }
 0x3a6   : > { %2182 = vmatprep.subr.mxu0 %v2174_v7 }
 0x3a7   : > { %v2520_v9 = vpop.permute.xlu0 %2519  ;;  %3671 = vmatmul.mubr.msk.f32.vlgmr.msra.gmra.mrb[6].mxu1 %vm301_vm2, %v4071_v36  ;;  %2183 = vmatpush1.msra.mxu0 %v2173_v8 }
 0x3a8   : > { %3674 = vmatpush3.msra.mxu1 %v2171_v6  ;;  %3543 = vmatmul.mubr.msk.f32.vlgmr.msra.gmra.mrb[2].mxu0 %vm301_vm2, %v2163_v56  ;;  %v2700_v10 = vpop.permute.xlu1 %2699 }
 0x3a9   : > { %3675 = vmatprep.mubr.msk.f32.mxu1 %vm301_vm2, %v2163_v56  ;;  %2252 = vmatprep.mubr.f32.mxu0 %v3834_v0 }
 0x3ab   : > { %v2349_v11 = vpop.permute.xlu0 %2348 }
 0x3ac   : > { %3544 = vmatmul.mubr.msk.f32.gmra.mrb[4].mxu0 %vm301_vm2, %v2165_v58  ;;  %3678 = vmatprep.subr.mxu1 %v2349_v11  ;;  %v2347_v12 = vpop.permute.xlu1 %2346 }
 0x3ad   : > { %v2350_v13 = vsel %vm1556_vm9, %v2345_v59, %v2347_v12  ;;  %v2351_v14 = vsel %vm1556_vm9, %v2347_v12, %v2349_v11  ;;  %2423 = vmatprep.mubr.f32.mxu0 %v3834_v0 }
 0x3ae   : > { %2359 = vmatprep.subr.mxu0 %v2351_v14 }
 0x3af   : > { %v2696_v15 = vpop.permute.xlu0 %2695  ;;  %3676 = vmatmul.mubr.msk.f32.vlgmr.msra.gmra.mrb[6].mxu1 %vm301_vm2, %v2165_v58  ;;  %2360 = vmatpush1.msra.mxu0 %v2350_v13 }
 0x3b0   : > { %3679 = vmatpush3.msra.mxu1 %v2349_v11  ;;  %3547 = vmatmul.mubr.msk.f32.vlgmr.msra.gmra.mrb[2].mxu0 %vm301_vm2, %v2341_v60  ;;  %v2698_v16 = vpop.permute.xlu1 %2697 }
 0x3b1   : > { %3680 = vmatprep.mubr.msk.f32.mxu1 %vm301_vm2, %v2341_v60  ;;  %2429 = vmatprep.mubr.f32.mxu0 %v3834_v0 }
 0x3b3   : > { %v2524_v17 = vpop.permute.xlu0 %2523 }
 0x3b4   : > { %3548 = vmatmul.mubr.msk.f32.gmra.mrb[4].mxu0 %vm301_vm2, %v2343_v63  ;;  %v2526_v18 = vpop.permute.xlu1 %2525  ;;  %v2528_v20 = vsel %vm2527_vm15, %v2522_v3, %v2524_v17 }
 0x3b5   : > { %3683 = vmatprep.subr.mxu1 %v2526_v18  ;;  %v2529_v19 = vsel %vm2527_vm15, %v2524_v17, %v2526_v18  ;;  %2601 = vmatprep.mubr.f32.mxu0 %v3834_v0 }
 0x3b6   : > { %2537 = vmatprep.subr.mxu0 %v2529_v19 }
 0x3b7   : > { %v2886_v21 = vpop.permute.xlu0 %2885  ;;  %3681 = vmatmul.mubr.msk.f32.vlgmr.msra.gmra.mrb[6].mxu1 %vm301_vm2, %v2343_v63  ;;  %2538 = vmatpush1.msra.mxu0 %v2528_v20 }
 0x3b8   : > { %3684 = vmatpush3.msra.mxu1 %v2526_v18  ;;  %3551 = vmatmul.mubr.msk.f32.vlgmr.msra.gmra.mrb[2].mxu0 %vm301_vm2, %v2518_v4  ;;  %v2878_v22 = vpop.permute.xlu1 %2877 }
 0x3b9   : > { %3685 = vmatprep.mubr.msk.f32.mxu1 %vm301_vm2, %v2518_v4  ;;  %2607 = vmatprep.mubr.f32.mxu0 %v3834_v0 }
 0x3bb   : > { %v2704_v23 = vpop.permute.xlu0 %2703 }
 0x3bc   : > { %3552 = vmatmul.mubr.msk.f32.gmra.mrb[4].mxu0 %vm301_vm2, %v2520_v9  ;;  %3688 = vmatprep.subr.mxu1 %v2704_v23  ;;  %v2702_v24 = vpop.permute.xlu1 %2701 }
 0x3bd   : > { %v2706_v25 = vsel %vm2705_vm0, %v2700_v10, %v2702_v24  ;;  %v2707_v26 = vsel %vm2705_vm0, %v2702_v24, %v2704_v23  ;;  %2779 = vmatprep.mubr.f32.mxu0 %v3834_v0 }
 0x3be   : > { %2715 = vmatprep.subr.mxu0 %v2707_v26 }
 0x3bf   : > { %v2892_v27 = vpop.permute.xlu0 %2891  ;;  %3686 = vmatmul.mubr.msk.f32.vlgmr.msra.gmra.mrb[6].mxu1 %vm301_vm2, %v2520_v9  ;;  %2716 = vmatpush1.msra.mxu0 %v2706_v25 }
 0x3c0   : > { %3689 = vmatpush3.msra.mxu1 %v2704_v23  ;;  %3555 = vmatmul.mubr.msk.f32.vlgmr.msra.gmra.mrb[2].mxu0 %vm301_vm2, %v2696_v15  ;;  %v2880_v28 = vpop.permute.xlu1 %2879 }
 0x3c1   : > { %3690 = vmatprep.mubr.msk.f32.mxu1 %vm301_vm2, %v2696_v15  ;;  %2785 = vmatprep.mubr.f32.mxu0 %v3834_v0 }
 0x3c3   : > { %v2888_v29 = vpop.permute.xlu0 %2887 }
 0x3c4   : > { %3556 = vmatmul.mubr.msk.f32.gmra.mrb[4].mxu0 %vm301_vm2, %v2698_v16  ;;  %v2890_v30 = vpop.permute.xlu1 %2889  ;;  %v2894_v33 = vsel %vm2893_vm1, %v2886_v21, %v2888_v29 }
 0x3c5   : > { %v2895_v31 = vsel %vm2893_vm1, %v2888_v29, %v2890_v30  ;;  %v2896_v32 = vsel %vm2893_vm1, %v2890_v30, %v2892_v27  ;;  %2968 = vmatprep.mubr.f32.mxu0 %v3834_v0 }
 0x3c6   : > { %2904 = vmatprep.subr.mxu0 %v2895_v31  ;;  %3693 = vmatprep.subr.mxu1 %v2896_v32 }
 0x3c7   : > { %v3067_v34 = vpop.permute.xlu0 %3066  ;;  %3691 = vmatmul.mubr.msk.f32.vlgmr.msra.gmra.mrb[6].mxu1 %vm301_vm2, %v2698_v16  ;;  %2905 = vmatpush1.msra.mxu0 %v2894_v33 }
 0x3c8   : > { %3694 = vmatpush3.msra.mxu1 %v2896_v32  ;;  %3559 = vmatmul.mubr.msk.f32.vlgmr.msra.gmra.mrb[2].mxu0 %vm301_vm2, %v2878_v22  ;;  %v3063_v35 = vpop.permute.xlu1 %3062 }
 0x3c9   : > { %3695 = vmatprep.mubr.msk.f32.mxu1 %vm301_vm2, %v2878_v22  ;;  %2974 = vmatprep.mubr.f32.mxu0 %v3834_v0 }
 0x3cb   : > { %v3069_v36 = vpop.permute.xlu0 %3068 }
 0x3cc   : > { %3560 = vmatmul.mubr.msk.f32.gmra.mrb[4].mxu0 %vm301_vm2, %v2880_v28  ;;  %v3071_v37 = vpop.permute.xlu1 %3070  ;;  %v3075_v39 = vsel %vm3074_vm3, %v3067_v34, %v3069_v36 }
 0x3cd   : > { %v3076_v38 = vsel %vm3074_vm3, %v3069_v36, %v3071_v37  ;;  %3149 = vmatprep.mubr.f32.mxu0 %v3834_v0 }
 0x3ce   : > { %3085 = vmatprep.subr.mxu0 %v3076_v38 }
 0x3cf   : > { %v3073_v40 = vpop.permute.xlu0 %3072  ;;  %3696 = vmatmul.mubr.msk.f32.vlgmr.msra.gmra.mrb[6].mxu1 %vm301_vm2, %v2880_v28  ;;  %3086 = vmatpush1.msra.mxu0 %v3075_v39 }
 0x3d0   : > { %3563 = vmatmul.mubr.msk.f32.vlgmr.msra.gmra.mrb[2].mxu0 %vm301_vm2, %v3063_v35  ;;  %3700 = vmatprep.mubr.msk.f32.mxu1 %vm301_vm2, %v3063_v35  ;;  %v3065_v41 = vpop.permute.xlu1 %3064  ;;  %v3077_v42 = vsel %vm3074_vm3, %v3071_v37, %v3073_v40 }
 0x3d1   : > { %3698 = vmatprep.subr.mxu1 %v3077_v42  ;;  %3155 = vmatprep.mubr.f32.mxu0 %v3834_v0 }
 0x3d2   : > { %3699 = vmatpush3.msra.mxu1 %v3077_v42 }
 0x3d3   : > { %v3250_v43 = vpop.permute.xlu0 %3249 }
 0x3d4   : > { %3564 = vmatmul.mubr.msk.f32.gmra.mrb[4].mxu0 %vm301_vm2, %v3065_v41  ;;  %v3252_v44 = vpop.permute.xlu1 %3251 }
 0x3d5   : > { %v3257_v45 = vsel %vm3255_vm4, %v3250_v43, %v3252_v44  ;;  %3330 = vmatprep.mubr.f32.mxu0 %v3834_v0 }
 0x3d6   : > { %3266 = vmatprep.subr.mxu0 %v3257_v45 }
 0x3d7   : > { %v3248_v46 = vpop.permute.xlu0 %3247  ;;  %3701 = vmatmul.mubr.msk.f32.vlgmr.msra.gmra.mrb[6].mxu1 %vm301_vm2, %v3065_v41 }
 0x3d8   : > { %v3256_v47 = vsel %vm3255_vm4, %v3248_v46, %v3250_v43  ;;  %v3244_v48 = vpop.permute.xlu1 %3243 }
 0x3d9   : > { %3267 = vmatpush1.msra.mxu0 %v3256_v47  ;;  %3705 = vmatprep.mubr.msk.f32.mxu1 %vm301_vm2, %v3244_v48 }
 0x3da   : > { %3567 = vmatmul.mubr.msk.f32.vlgmr.msra.gmra.mrb[2].mxu0 %vm301_vm2, %v3244_v48 }
 0x3db   : > { %v3254_v49 = vpop.permute.xlu0 %3253  ;;  %3336 = vmatprep.mubr.f32.mxu0 %v3834_v0 }
 0x3dc   : > { %v3258_v50 = vsel %vm3255_vm4, %v3252_v44, %v3254_v49  ;;  %v3246_v51 = vpop.permute.xlu1 %3245 }
 0x3dd   : > { %3703 = vmatprep.subr.mxu1 %v3258_v50 }
 0x3de   : > { %3568 = vmatmul.mubr.msk.f32.gmra.mrb[4].mxu0 %vm301_vm2, %v3246_v51  ;;  %3704 = vmatpush3.msra.mxu1 %v3258_v50 }
 0x3df   : > { %3706 = vmatmul.mubr.msk.f32.vlgmr.msra.gmra.mrb[6].mxu1 %vm301_vm2, %v3246_v51  ;;  %vm3450_vm2 = vcmask 556032  }
 0x3ec   : > { %v3429_v59 = vpop.permute.xlu0 %3428 }
 0x3ed   : > { %v3434_v61 = vpop.permute.xlu1 %3433 }
 0x472   : > { %v2076_v52 = vpop.f32.mrb[2].mxu1 }
 0x473   : > { %v2078_v53 = vpop.f32.mrb[3].mxu1 }
 0x476   : > { %v2082_v54 = vpop.f32.mrb[4].mxu1 }
 0x477   : > { %v2084_v55 = vpop.f32.mrb[5].mxu1 }
 0x4ad   : > { %v3332_v56 = vpop.f32.mrb[2].mxu0 }
 0x4ae   : > { %v3708_v57 = vadd.f32 %v3332_v56, %v2076_v52  ;;  %v3334_v58 = vpop.f32.mrb[3].mxu0 }
 0x4af   : > { %v3709_v60 = vadd.f32 %v3334_v58, %v2078_v53 }
 0x4b0   : > { %v3436_v0 = vadd.f32 %v3708_v57, %v3429_v59 }
 0x4b1   : > { %v3437_v62 = vadd.f32 %v3709_v60, %v3429_v59  ;;  %v3338_v63 = vpop.f32.mrb[4].mxu0 }
 0x4b2   : > { %v3442_v1 = vmax.f32 %v3436_v0, 0.0  ;;  %v3710_v2 = vadd.f32 %v3338_v63, %v2082_v54  ;;  %v3340_v3 = vpop.f32.mrb[5].mxu0  ;;  %v3707_v4 = vpop.f32.mrb[6].mxu1 }
 0x4b3   : > { %v3443_v5 = vmax.f32 %v3437_v62, 0.0  ;;  %v3711_v6 = vadd.f32 %v3340_v3, %v2084_v55  ;;  %v3441_v7 = vadd.f32 %v3707_v4, %v3434_v61  ;;  %v3409_v8 = vpop.f32.mrb[7].mxu1 }
 0x4b4   : > { %3448 = vst [vmem:[%s278_s8] sm:$0xff] %v3442_v1  ;;  %v3439_v9 = vadd.f32 %v3710_v2, %v3434_v61  ;;  %v3438_v10 = vadd.f32 %v3429_v59, %v3409_v8 }
 0x4b5   : > { %3449 = vst [vmem:[%s278_s8 + $0x8] sm:$0xff] %v3443_v5  ;;  %v3440_v11 = vadd.f32 %v3711_v6, %v3434_v61  ;;  %v3447_v12 = vmax.f32 %v3441_v7, 0.0 }
 0x4b6   : > { %v3445_v13 = vmax.f32 %v3439_v9, 0.0  ;;  %v3444_v14 = vmax.f32 %v3438_v10, 0.0 }
 0x4b7   : > { %v3446_v15 = vmax.f32 %v3440_v11, 0.0  ;;  %3454 = vst.msk [vmem:[%s278_s8 + $0x28] sm:$0xff] %vm3450_vm2, %v3447_v12 }
 0x4b8   : > { %3452 = vst [vmem:[%s278_s8 + $0x18] sm:$0xff] %v3445_v13  ;;  %3451 = vst.msk [vmem:[%s278_s8 + $0x10] sm:$0xff] %vm3450_vm2, %v3444_v14 }
 0x4b9   : > { %3453 = vst [vmem:[%s278_s8 + $0x20] sm:$0xff] %v3446_v15 }
 0x4ba PF: > { %s17_s24 = sadd.s32 1, %s3832_s24  }
 0x4bb   : > { %p14_p4 = scmp.ge.s32.totalorder %s17_s24, 4  }
 0x4bd   :  { %16 = sbr.rel (!%p14_p4) target bundleno = 1 (0x1), region = 78 }

</bundles_post_ra>
